<compile_context>
chip_gen: v6e
topology: v6e:2x2x1
jax: 0.10.0
libtpu: 0.0.40
codegen_flags: <defaults>
</compile_context>

<pallas_src>
import jax
import jax.numpy as jnp
from jax import lax
from jax.experimental import pallas as pl
from jax.experimental.pallas import tpu as pltpu

# ---------------- synthetic tiny-BERT config ----------------
VOCAB = 128
HIDDEN = 128
N_HEADS = 4
HEAD_DIM = HIDDEN // N_HEADS
INTERMEDIATE = 256
N_LAYERS = 2
MAX_SEQ = 8
N_CLASSES = 4
PAD_CLASSES = 128          # lane-dense classifier output width
LN_EPS = 1e-12

# ---------------- packed-slab row layouts ----------------
# bf16 weight slab, 128 lanes wide: per layer [wq, wk, wv, wo, w2] ; tail [wp, wc_pad]
W_WQ, W_WK, W_WV, W_WO, W_W2 = 0, 128, 256, 384, 512
W_ROWS_PER_LAYER = 768
W_WP = N_LAYERS * W_ROWS_PER_LAYER
W_WC = W_WP + HIDDEN
W_TOTAL_ROWS = W_WC + HIDDEN

# f32 vector slab, 128 lanes wide (one (1,128) vector per row)
V_EMB_G, V_EMB_B = 0, 1
V_BQ, V_BK, V_BV, V_BO = 0, 1, 2, 3
V_LN1G, V_LN1B = 4, 5
V_B1A, V_B1B, V_B2 = 6, 7, 8
V_LN2G, V_LN2B = 9, 10
V_ROWS_PER_LAYER = 11
V_LAYER_BASE = 2
V_BP = V_LAYER_BASE + N_LAYERS * V_ROWS_PER_LAYER
V_BC = V_BP + 1
V_TOTAL_ROWS = V_BC + 1


# ---------------- in-kernel helpers ----------------
def _layernorm(x, g, b):
    mean = jnp.mean(x, axis=-1, keepdims=True)
    var = jnp.mean(jnp.square(x - mean), axis=-1, keepdims=True)
    return (x - mean) * lax.rsqrt(var + LN_EPS) * g + b


def _gelu(x):
    # tanh-approximate GELU (EUP tanh); differs from exact erf GELU by <1e-3.
    c = 0.7978845608028654  # sqrt(2/pi)
    return 0.5 * x * (1.0 + jnp.tanh(c * (x + 0.044715 * x * x * x)))


def _dot(a, b):
    # bf16 MXU operands, f32 accumulation.
    return jnp.dot(a.astype(jnp.bfloat16), b.astype(jnp.bfloat16),
                   preferred_element_type=jnp.float32)


def _dot_nt(a, b):
    # a @ b.T without an explicit transpose (contract last dims of both).
    return lax.dot_general(a.astype(jnp.bfloat16), b.astype(jnp.bfloat16),
                           (((1,), (1,)), ((), ())),
                           preferred_element_type=jnp.float32)


# ---------------- the single fused kernel ----------------
def fused_forward_kernel(x_ref, bias_ref, vec_ref, w_ref, w1_ref, o_ref):
    def vrow(i):                      # (1,128) f32 bias / LN vector
        return vec_ref[i:i + 1, :]

    def wblk(start, nrows):           # (nrows,128) bf16 weight block
        return w_ref[start:start + nrows, :]

    bias2d = bias_ref[...]                                      # (R, R)
    x = _layernorm(x_ref[...], vrow(V_EMB_G), vrow(V_EMB_B))    # (R, H) f32
    scale = 1.0 / float(HEAD_DIM) ** 0.5

    for l in range(N_LAYERS):
        wb = l * W_ROWS_PER_LAYER
        vb = V_LAYER_BASE + l * V_ROWS_PER_LAYER

        q = _dot(x, wblk(wb + W_WQ, HIDDEN)) + vrow(vb + V_BQ)
        k = _dot(x, wblk(wb + W_WK, HIDDEN)) + vrow(vb + V_BK)
        v = _dot(x, wblk(wb + W_WV, HIDDEN)) + vrow(vb + V_BV)

        # per-head attention; contexts concatenated -> ONE fused Wo matmul
        ctx_parts = []
        for h in range(N_HEADS):
            sl = slice(h * HEAD_DIM, (h + 1) * HEAD_DIM)
            s = _dot_nt(q[:, sl], k[:, sl]) * scale + bias2d    # (R, R)
            m = jnp.max(s, axis=-1, keepdims=True)
            p = jnp.exp(s - m)
            p = p * pl.reciprocal(jnp.sum(p, axis=-1, keepdims=True),
                                  approx=True)
            ctx_parts.append(_dot(p, v[:, sl]))                 # (R, HEAD_DIM)
        ctx = jnp.concatenate(ctx_parts, axis=-1)               # (R, H)
        attn_out = _dot(ctx, wblk(wb + W_WO, HIDDEN)) + vrow(vb + V_BO)

        h1 = _layernorm(x + attn_out, vrow(vb + V_LN1G), vrow(vb + V_LN1B))

        b1 = jnp.concatenate([vrow(vb + V_B1A), vrow(vb + V_B1B)], axis=-1)
        ff = _gelu(_dot(h1, w1_ref[l * HIDDEN:(l + 1) * HIDDEN, :]) + b1)
        ff_out = _dot(ff, wblk(wb + W_W2, INTERMEDIATE)) + vrow(vb + V_B2)

        x = _layernorm(h1 + ff_out, vrow(vb + V_LN2G), vrow(vb + V_LN2B))

    # Pooler + classifier applied to every row (cheap); CLS rows selected
    # outside.  Output store is lane-dense (R, 128).
    pooled = jnp.tanh(_dot(x, wblk(W_WP, HIDDEN)) + vrow(V_BP))
    o_ref[...] = _dot(pooled, wblk(W_WC, HIDDEN)) + vrow(V_BC)


# ---------------- grid selection (v7x second TensorCore) ----------------
def _num_batch_blocks(batch):
    kind = ""
    try:
        kind = jax.devices()[0].device_kind.lower()
    except Exception:
        pass
    # Two TensorCores per chip only on v7x; elsewhere a grid axis is a serial loop.
    if ("v7" in kind or "tpu7" in kind) and batch % 2 == 0:
        return 2
    return 1


# ---------------- full forward (matches SentimentClassifier.forward) --------
def sentiment_classifier_forward(params, input_ids, attention_mask):
    B, S = input_ids.shape

    # embeddings (gather = JAX glue)
    emb = (params['word_emb'][input_ids]
           + params['pos_emb'][jnp.arange(S)][None, :, :]
           + params['type_emb'][0][None, None, :])
    x2d = emb.reshape(B * S, HIDDEN).astype(jnp.float32)

    G = _num_batch_blocks(B)
    rows = (B // G) * S                      # activation rows per grid block

    # additive attention bias: block-diagonal across batches + key padding,
    # regrouped so each grid block gets its own (rows, rows) tile.
    key_mask = attention_mask.astype(jnp.float32)                    # (B, S)
    same_batch = jnp.eye(B, dtype=jnp.float32)                       # (B, B)
    valid = same_batch[:, None, :, None] * key_mask[None, None, :, :]
    valid = jnp.broadcast_to(valid, (B, S, B, S)).reshape(B * S, B * S)
    bias_full = (1.0 - valid) * -1e4
    bias = jnp.concatenate(
        [bias_full[g * rows:(g + 1) * rows, g * rows:(g + 1) * rows]
         for g in range(G)], axis=0)                                 # (B*S, rows)

    # ---- pack parameters into 3 slabs (3 weight DMAs instead of ~30) ----
    wc_pad = jnp.zeros((HIDDEN, PAD_CLASSES), jnp.float32)
    wc_pad = wc_pad.at[:, :N_CLASSES].set(params['wc'])
    bc_pad = jnp.zeros((1, PAD_CLASSES), jnp.float32)
    bc_pad = bc_pad.at[:, :N_CLASSES].set(params['bc'])

    w_rows, w1_rows = [], []
    vec_rows = [params['emb_ln_g'], params['emb_ln_b']]
    for lp in params['layers']:
        w_rows += [lp['wq'], lp['wk'], lp['wv'], lp['wo'], lp['w2']]
        w1_rows += [lp['w1']]
        vec_rows += [lp['bq'], lp['bk'], lp['bv'], lp['bo'],
                     lp['ln1_g'], lp['ln1_b'],
                     lp['b1'][:, :HIDDEN], lp['b1'][:, HIDDEN:],
                     lp['b2'], lp['ln2_g'], lp['ln2_b']]
    w_rows += [params['wp'], wc_pad]
    vec_rows += [params['bp'], bc_pad]

    w_slab = jnp.concatenate(w_rows, axis=0).astype(jnp.bfloat16)     # (1792,128)
    w1_slab = jnp.concatenate(w1_rows, axis=0).astype(jnp.bfloat16)   # (256,256)
    vec_slab = jnp.concatenate(vec_rows, axis=0).astype(jnp.float32)  # (26,128)
    assert w_slab.shape == (W_TOTAL_ROWS, HIDDEN)
    assert w1_slab.shape == (N_LAYERS * HIDDEN, INTERMEDIATE)
    assert vec_slab.shape == (V_TOTAL_ROWS, HIDDEN)

    cost = pl.CostEstimate(flops=10_000_000, transcendentals=13_000,
                           bytes_accessed=620_000)

    logits_pad = pl.pallas_call(
        fused_forward_kernel,
        out_shape=jax.ShapeDtypeStruct((B * S, PAD_CLASSES), jnp.float32),
        grid=(G,),
        in_specs=[
            pl.BlockSpec((rows, HIDDEN), lambda g: (g, 0)),      # activations
            pl.BlockSpec((rows, rows), lambda g: (g, 0)),        # attention bias
            pl.BlockSpec(vec_slab.shape, lambda g: (0, 0)),      # bias/LN slab
            pl.BlockSpec(w_slab.shape, lambda g: (0, 0)),        # 128-lane weights
            pl.BlockSpec(w1_slab.shape, lambda g: (0, 0)),       # 256-lane FFN up
        ],
        out_specs=pl.BlockSpec((rows, PAD_CLASSES), lambda g: (g, 0)),
        compiler_params=pltpu.CompilerParams(
            dimension_semantics=("parallel",)),
        cost_estimate=cost,
    )(x2d, bias, vec_slab, w_slab, w1_slab)

    # CLS tokens are rows 0, S, 2S, ... ; classes are the first N_CLASSES lanes.
    logits = logits_pad[0::S, :N_CLASSES]                            # (B, n_cls)

    # torch.sort(logits, descending=True) -> indices ; take top-2 of batch 0
    top_indices = jnp.argsort(-logits, axis=-1)[:, :2]
    return top_indices[0]


# ---------------- deterministic parameter init ----------------
def init_params(key):
    keys = iter(jax.random.split(key, 128))

    def dense(n_in, n_out):
        w = 0.02 * jax.random.normal(next(keys), (n_in, n_out), jnp.float32)
        b = jnp.zeros((1, n_out), jnp.float32)
        return w, b

    p = {}
    p['word_emb'] = 0.02 * jax.random.normal(next(keys), (VOCAB, HIDDEN), jnp.float32)
    p['pos_emb'] = 0.02 * jax.random.normal(next(keys), (MAX_SEQ, HIDDEN), jnp.float32)
    p['type_emb'] = 0.02 * jax.random.normal(next(keys), (2, HIDDEN), jnp.float32)
    p['emb_ln_g'] = jnp.ones((1, HIDDEN), jnp.float32)
    p['emb_ln_b'] = jnp.zeros((1, HIDDEN), jnp.float32)

    layers = []
    for _ in range(N_LAYERS):
        lp = {}
        lp['wq'], lp['bq'] = dense(HIDDEN, HIDDEN)
        lp['wk'], lp['bk'] = dense(HIDDEN, HIDDEN)
        lp['wv'], lp['bv'] = dense(HIDDEN, HIDDEN)
        lp['wo'], lp['bo'] = dense(HIDDEN, HIDDEN)
        lp['ln1_g'] = jnp.ones((1, HIDDEN), jnp.float32)
        lp['ln1_b'] = jnp.zeros((1, HIDDEN), jnp.float32)
        lp['w1'], lp['b1'] = dense(HIDDEN, INTERMEDIATE)
        lp['w2'], lp['b2'] = dense(INTERMEDIATE, HIDDEN)
        lp['ln2_g'] = jnp.ones((1, HIDDEN), jnp.float32)
        lp['ln2_b'] = jnp.zeros((1, HIDDEN), jnp.float32)
        layers.append(lp)
    p['layers'] = layers

    p['wp'], p['bp'] = dense(HIDDEN, HIDDEN)        # pooler
    p['wc'], p['bc'] = dense(HIDDEN, N_CLASSES)     # classifier
    return p


if __name__ == "__main__":
    key = jax.random.PRNGKey(0)
    k_param, k_ids = jax.random.split(key)

    params = init_params(k_param)

    B, S = 2, MAX_SEQ
    input_ids = jax.random.randint(k_ids, (B, S), 0, VOCAB, dtype=jnp.int32)
    attention_mask = jnp.array([[1, 1, 1, 1, 1, 1, 0, 0],
                                [1, 1, 1, 1, 0, 0, 0, 0]], dtype=jnp.int32)

    forward = jax.jit(sentiment_classifier_forward)
    out = forward(params, input_ids, attention_mask)
    out = jax.block_until_ready(out)
    assert out.shape == (2,)
    print("KERNEL_OK")
</pallas_src>

<mosaic_0001>
module attributes {stable_mosaic.version = 11 : i64} {
  func.func @fused_forward_kernel(%arg0: i32, %arg1: memref<16x128xf32, #tpu.memory_space<vmem>>, %arg2: memref<16x16xf32, #tpu.memory_space<vmem>>, %arg3: memref<26x128xf32, #tpu.memory_space<vmem>>, %arg4: memref<1792x128xbf16, #tpu.memory_space<vmem>>, %arg5: memref<256x256xbf16, #tpu.memory_space<vmem>>, %arg6: memref<16x128xf32, #tpu.memory_space<vmem>>) attributes {dimension_semantics = [#tpu.dimension_semantics<parallel>], iteration_bounds = array<i64: 1>, scalar_prefetch = 0 : i64, scratch_operands = 0 : i64, tpu.core_type = #tpu.core_type<tc>, window_params = [{transform_indices = @transform_0, window_bounds = array<i64: 16, 128>}, {transform_indices = @transform_1, window_bounds = array<i64: 16, 16>}, {pipeline_mode = #tpu.pipeline_mode<synchronous>, transform_indices = @transform_2, window_bounds = array<i64: 26, 128>}, {pipeline_mode = #tpu.pipeline_mode<synchronous>, transform_indices = @transform_3, window_bounds = array<i64: 1792, 128>}, {pipeline_mode = #tpu.pipeline_mode<synchronous>, transform_indices = @transform_4, window_bounds = array<i64: 256, 256>}, {transform_indices = @transform_5, window_bounds = array<i64: 16, 128>}]} {
    %c0 = arith.constant 0 : index
    %c0_0 = arith.constant 0 : index
    %0 = vector.load %arg2[%c0, %c0_0] : memref<16x16xf32, #tpu.memory_space<vmem>>, vector<16x16xf32>
    %c0_1 = arith.constant 0 : index
    %c0_2 = arith.constant 0 : index
    %1 = vector.load %arg1[%c0_1, %c0_2] : memref<16x128xf32, #tpu.memory_space<vmem>>, vector<16x128xf32>
    %c0_3 = arith.constant 0 : index
    %c0_4 = arith.constant 0 : index
    %2 = vector.load %arg3[%c0_3, %c0_4] : memref<26x128xf32, #tpu.memory_space<vmem>>, vector<1x128xf32>
    %c1 = arith.constant 1 : index
    %c0_5 = arith.constant 0 : index
    %3 = vector.load %arg3[%c1, %c0_5] : memref<26x128xf32, #tpu.memory_space<vmem>>, vector<1x128xf32>
    %cst = arith.constant dense<0.000000e+00> : vector<16xf32>
    %4 = vector.multi_reduction <add>, %1, %cst [1] : vector<16x128xf32> to vector<16xf32>
    %5 = vector.shape_cast %4 : vector<16xf32> to vector<16x1xf32>
    %cst_6 = arith.constant 1.280000e+02 : f32
    %6 = vector.broadcast %cst_6 : f32 to vector<16x1xf32>
    %7 = arith.divf %5, %6 : vector<16x1xf32>
    %8 = vector.broadcast %7 : vector<16x1xf32> to vector<16x128xf32>
    %9 = arith.subf %1, %8 : vector<16x128xf32>
    %10 = arith.mulf %9, %9 : vector<16x128xf32>
    %cst_7 = arith.constant dense<0.000000e+00> : vector<16xf32>
    %11 = vector.multi_reduction <add>, %10, %cst_7 [1] : vector<16x128xf32> to vector<16xf32>
    %12 = vector.shape_cast %11 : vector<16xf32> to vector<16x1xf32>
    %cst_8 = arith.constant 1.280000e+02 : f32
    %13 = vector.broadcast %cst_8 : f32 to vector<16x1xf32>
    %14 = arith.divf %12, %13 : vector<16x1xf32>
    %15 = vector.broadcast %7 : vector<16x1xf32> to vector<16x128xf32>
    %16 = arith.subf %1, %15 : vector<16x128xf32>
    %cst_9 = arith.constant 9.99999996E-13 : f32
    %17 = vector.broadcast %cst_9 : f32 to vector<16x1xf32>
    %18 = arith.addf %14, %17 : vector<16x1xf32>
    %19 = math.rsqrt %18 : vector<16x1xf32>
    %20 = vector.broadcast %19 : vector<16x1xf32> to vector<16x128xf32>
    %21 = arith.mulf %16, %20 : vector<16x128xf32>
    %22 = vector.broadcast %2 : vector<1x128xf32> to vector<16x128xf32>
    %23 = arith.mulf %21, %22 : vector<16x128xf32>
    %24 = vector.broadcast %3 : vector<1x128xf32> to vector<16x128xf32>
    %25 = arith.addf %23, %24 : vector<16x128xf32>
    %c0_10 = arith.constant 0 : index
    %c0_11 = arith.constant 0 : index
    %26 = vector.load %arg4[%c0_10, %c0_11] : memref<1792x128xbf16, #tpu.memory_space<vmem>>, vector<128x128xbf16>
    %27 = arith.truncf %25 : vector<16x128xf32> to vector<16x128xbf16>
    %cst_12 = arith.constant dense<0.000000e+00> : vector<16x128xf32>
    %28 = tpu.matmul %27, %26, %cst_12 {dimension_numbers = #tpu.dot_dimension_numbers<[1], [0], [0], [1], [0, 0, 1, 1], [], []>} : vector<16x128xbf16>, vector<128x128xbf16>, vector<16x128xf32> -> vector<16x128xf32>
    %c2 = arith.constant 2 : index
    %c0_13 = arith.constant 0 : index
    %29 = vector.load %arg3[%c2, %c0_13] : memref<26x128xf32, #tpu.memory_space<vmem>>, vector<1x128xf32>
    %30 = vector.broadcast %29 : vector<1x128xf32> to vector<16x128xf32>
    %31 = arith.addf %28, %30 : vector<16x128xf32>
    %c128 = arith.constant 128 : index
    %c0_14 = arith.constant 0 : index
    %32 = vector.load %arg4[%c128, %c0_14] : memref<1792x128xbf16, #tpu.memory_space<vmem>>, vector<128x128xbf16>
    %33 = arith.truncf %25 : vector<16x128xf32> to vector<16x128xbf16>
    %cst_15 = arith.constant dense<0.000000e+00> : vector<16x128xf32>
    %34 = tpu.matmul %33, %32, %cst_15 {dimension_numbers = #tpu.dot_dimension_numbers<[1], [0], [0], [1], [0, 0, 1, 1], [], []>} : vector<16x128xbf16>, vector<128x128xbf16>, vector<16x128xf32> -> vector<16x128xf32>
    %c3 = arith.constant 3 : index
    %c0_16 = arith.constant 0 : index
    %35 = vector.load %arg3[%c3, %c0_16] : memref<26x128xf32, #tpu.memory_space<vmem>>, vector<1x128xf32>
    %36 = vector.broadcast %35 : vector<1x128xf32> to vector<16x128xf32>
    %37 = arith.addf %34, %36 : vector<16x128xf32>
    %c256 = arith.constant 256 : index
    %c0_17 = arith.constant 0 : index
    %38 = vector.load %arg4[%c256, %c0_17] : memref<1792x128xbf16, #tpu.memory_space<vmem>>, vector<128x128xbf16>
    %39 = arith.truncf %25 : vector<16x128xf32> to vector<16x128xbf16>
    %cst_18 = arith.constant dense<0.000000e+00> : vector<16x128xf32>
    %40 = tpu.matmul %39, %38, %cst_18 {dimension_numbers = #tpu.dot_dimension_numbers<[1], [0], [0], [1], [0, 0, 1, 1], [], []>} : vector<16x128xbf16>, vector<128x128xbf16>, vector<16x128xf32> -> vector<16x128xf32>
    %c4 = arith.constant 4 : index
    %c0_19 = arith.constant 0 : index
    %41 = vector.load %arg3[%c4, %c0_19] : memref<26x128xf32, #tpu.memory_space<vmem>>, vector<1x128xf32>
    %42 = vector.broadcast %41 : vector<1x128xf32> to vector<16x128xf32>
    %43 = arith.addf %40, %42 : vector<16x128xf32>
    %44 = vector.extract_strided_slice %31 {offsets = [0, 0], sizes = [16, 32], strides = [1, 1]} : vector<16x128xf32> to vector<16x32xf32>
    %45 = vector.extract_strided_slice %37 {offsets = [0, 0], sizes = [16, 32], strides = [1, 1]} : vector<16x128xf32> to vector<16x32xf32>
    %46 = arith.truncf %44 : vector<16x32xf32> to vector<16x32xbf16>
    %47 = arith.truncf %45 : vector<16x32xf32> to vector<16x32xbf16>
    %cst_20 = arith.constant dense<0.000000e+00> : vector<16x16xf32>
    %48 = tpu.matmul %46, %47, %cst_20 {dimension_numbers = #tpu.dot_dimension_numbers<[1], [1], [0], [0], [0, 0, 1, 0], [], []>} : vector<16x32xbf16>, vector<16x32xbf16>, vector<16x16xf32> -> vector<16x16xf32>
    %cst_21 = arith.constant 0.176776692 : f32
    %49 = vector.broadcast %cst_21 : f32 to vector<16x16xf32>
    %50 = arith.mulf %48, %49 : vector<16x16xf32>
    %51 = arith.addf %50, %0 : vector<16x16xf32>
    %cst_22 = arith.constant dense<0xFF800000> : vector<16xf32>
    %52 = vector.multi_reduction <maximumf>, %51, %cst_22 [1] : vector<16x16xf32> to vector<16xf32>
    %53 = vector.shape_cast %52 : vector<16xf32> to vector<16x1xf32>
    %54 = vector.broadcast %53 : vector<16x1xf32> to vector<16x16xf32>
    %55 = arith.subf %51, %54 : vector<16x16xf32>
    %56 = math.exp %55 : vector<16x16xf32>
    %cst_23 = arith.constant dense<0.000000e+00> : vector<16xf32>
    %57 = vector.multi_reduction <add>, %56, %cst_23 [1] : vector<16x16xf32> to vector<16xf32>
    %58 = vector.shape_cast %57 : vector<16xf32> to vector<16x1xf32>
    %59 = tpu.reciprocal %58 {approx = true} : vector<16x1xf32> -> vector<16x1xf32>
    %60 = vector.broadcast %59 : vector<16x1xf32> to vector<16x16xf32>
    %61 = arith.mulf %56, %60 : vector<16x16xf32>
    %62 = vector.extract_strided_slice %43 {offsets = [0, 0], sizes = [16, 32], strides = [1, 1]} : vector<16x128xf32> to vector<16x32xf32>
    %63 = arith.truncf %61 : vector<16x16xf32> to vector<16x16xbf16>
    %64 = arith.truncf %62 : vector<16x32xf32> to vector<16x32xbf16>
    %cst_24 = arith.constant dense<0.000000e+00> : vector<16x32xf32>
    %65 = tpu.matmul %63, %64, %cst_24 {dimension_numbers = #tpu.dot_dimension_numbers<[1], [0], [0], [1], [0, 0, 1, 1], [], []>} : vector<16x16xbf16>, vector<16x32xbf16>, vector<16x32xf32> -> vector<16x32xf32>
    %66 = vector.extract_strided_slice %31 {offsets = [0, 32], sizes = [16, 32], strides = [1, 1]} : vector<16x128xf32> to vector<16x32xf32>
    %67 = vector.extract_strided_slice %37 {offsets = [0, 32], sizes = [16, 32], strides = [1, 1]} : vector<16x128xf32> to vector<16x32xf32>
    %68 = arith.truncf %66 : vector<16x32xf32> to vector<16x32xbf16>
    %69 = arith.truncf %67 : vector<16x32xf32> to vector<16x32xbf16>
    %cst_25 = arith.constant dense<0.000000e+00> : vector<16x16xf32>
    %70 = tpu.matmul %68, %69, %cst_25 {dimension_numbers = #tpu.dot_dimension_numbers<[1], [1], [0], [0], [0, 0, 1, 0], [], []>} : vector<16x32xbf16>, vector<16x32xbf16>, vector<16x16xf32> -> vector<16x16xf32>
    %cst_26 = arith.constant 0.176776692 : f32
    %71 = vector.broadcast %cst_26 : f32 to vector<16x16xf32>
    %72 = arith.mulf %70, %71 : vector<16x16xf32>
    %73 = arith.addf %72, %0 : vector<16x16xf32>
    %cst_27 = arith.constant dense<0xFF800000> : vector<16xf32>
    %74 = vector.multi_reduction <maximumf>, %73, %cst_27 [1] : vector<16x16xf32> to vector<16xf32>
    %75 = vector.shape_cast %74 : vector<16xf32> to vector<16x1xf32>
    %76 = vector.broadcast %75 : vector<16x1xf32> to vector<16x16xf32>
    %77 = arith.subf %73, %76 : vector<16x16xf32>
    %78 = math.exp %77 : vector<16x16xf32>
    %cst_28 = arith.constant dense<0.000000e+00> : vector<16xf32>
    %79 = vector.multi_reduction <add>, %78, %cst_28 [1] : vector<16x16xf32> to vector<16xf32>
    %80 = vector.shape_cast %79 : vector<16xf32> to vector<16x1xf32>
    %81 = tpu.reciprocal %80 {approx = true} : vector<16x1xf32> -> vector<16x1xf32>
    %82 = vector.broadcast %81 : vector<16x1xf32> to vector<16x16xf32>
    %83 = arith.mulf %78, %82 : vector<16x16xf32>
    %84 = vector.extract_strided_slice %43 {offsets = [0, 32], sizes = [16, 32], strides = [1, 1]} : vector<16x128xf32> to vector<16x32xf32>
    %85 = arith.truncf %83 : vector<16x16xf32> to vector<16x16xbf16>
    %86 = arith.truncf %84 : vector<16x32xf32> to vector<16x32xbf16>
    %cst_29 = arith.constant dense<0.000000e+00> : vector<16x32xf32>
    %87 = tpu.matmul %85, %86, %cst_29 {dimension_numbers = #tpu.dot_dimension_numbers<[1], [0], [0], [1], [0, 0, 1, 1], [], []>} : vector<16x16xbf16>, vector<16x32xbf16>, vector<16x32xf32> -> vector<16x32xf32>
    %88 = vector.extract_strided_slice %31 {offsets = [0, 64], sizes = [16, 32], strides = [1, 1]} : vector<16x128xf32> to vector<16x32xf32>
    %89 = vector.extract_strided_slice %37 {offsets = [0, 64], sizes = [16, 32], strides = [1, 1]} : vector<16x128xf32> to vector<16x32xf32>
    %90 = arith.truncf %88 : vector<16x32xf32> to vector<16x32xbf16>
    %91 = arith.truncf %89 : vector<16x32xf32> to vector<16x32xbf16>
    %cst_30 = arith.constant dense<0.000000e+00> : vector<16x16xf32>
    %92 = tpu.matmul %90, %91, %cst_30 {dimension_numbers = #tpu.dot_dimension_numbers<[1], [1], [0], [0], [0, 0, 1, 0], [], []>} : vector<16x32xbf16>, vector<16x32xbf16>, vector<16x16xf32> -> vector<16x16xf32>
    %cst_31 = arith.constant 0.176776692 : f32
    %93 = vector.broadcast %cst_31 : f32 to vector<16x16xf32>
    %94 = arith.mulf %92, %93 : vector<16x16xf32>
    %95 = arith.addf %94, %0 : vector<16x16xf32>
    %cst_32 = arith.constant dense<0xFF800000> : vector<16xf32>
    %96 = vector.multi_reduction <maximumf>, %95, %cst_32 [1] : vector<16x16xf32> to vector<16xf32>
    %97 = vector.shape_cast %96 : vector<16xf32> to vector<16x1xf32>
    %98 = vector.broadcast %97 : vector<16x1xf32> to vector<16x16xf32>
    %99 = arith.subf %95, %98 : vector<16x16xf32>
    %100 = math.exp %99 : vector<16x16xf32>
    %cst_33 = arith.constant dense<0.000000e+00> : vector<16xf32>
    %101 = vector.multi_reduction <add>, %100, %cst_33 [1] : vector<16x16xf32> to vector<16xf32>
    %102 = vector.shape_cast %101 : vector<16xf32> to vector<16x1xf32>
    %103 = tpu.reciprocal %102 {approx = true} : vector<16x1xf32> -> vector<16x1xf32>
    %104 = vector.broadcast %103 : vector<16x1xf32> to vector<16x16xf32>
    %105 = arith.mulf %100, %104 : vector<16x16xf32>
    %106 = vector.extract_strided_slice %43 {offsets = [0, 64], sizes = [16, 32], strides = [1, 1]} : vector<16x128xf32> to vector<16x32xf32>
    %107 = arith.truncf %105 : vector<16x16xf32> to vector<16x16xbf16>
    %108 = arith.truncf %106 : vector<16x32xf32> to vector<16x32xbf16>
    %cst_34 = arith.constant dense<0.000000e+00> : vector<16x32xf32>
    %109 = tpu.matmul %107, %108, %cst_34 {dimension_numbers = #tpu.dot_dimension_numbers<[1], [0], [0], [1], [0, 0, 1, 1], [], []>} : vector<16x16xbf16>, vector<16x32xbf16>, vector<16x32xf32> -> vector<16x32xf32>
    %110 = vector.extract_strided_slice %31 {offsets = [0, 96], sizes = [16, 32], strides = [1, 1]} : vector<16x128xf32> to vector<16x32xf32>
    %111 = vector.extract_strided_slice %37 {offsets = [0, 96], sizes = [16, 32], strides = [1, 1]} : vector<16x128xf32> to vector<16x32xf32>
    %112 = arith.truncf %110 : vector<16x32xf32> to vector<16x32xbf16>
    %113 = arith.truncf %111 : vector<16x32xf32> to vector<16x32xbf16>
    %cst_35 = arith.constant dense<0.000000e+00> : vector<16x16xf32>
    %114 = tpu.matmul %112, %113, %cst_35 {dimension_numbers = #tpu.dot_dimension_numbers<[1], [1], [0], [0], [0, 0, 1, 0], [], []>} : vector<16x32xbf16>, vector<16x32xbf16>, vector<16x16xf32> -> vector<16x16xf32>
    %cst_36 = arith.constant 0.176776692 : f32
    %115 = vector.broadcast %cst_36 : f32 to vector<16x16xf32>
    %116 = arith.mulf %114, %115 : vector<16x16xf32>
    %117 = arith.addf %116, %0 : vector<16x16xf32>
    %cst_37 = arith.constant dense<0xFF800000> : vector<16xf32>
    %118 = vector.multi_reduction <maximumf>, %117, %cst_37 [1] : vector<16x16xf32> to vector<16xf32>
    %119 = vector.shape_cast %118 : vector<16xf32> to vector<16x1xf32>
    %120 = vector.broadcast %119 : vector<16x1xf32> to vector<16x16xf32>
    %121 = arith.subf %117, %120 : vector<16x16xf32>
    %122 = math.exp %121 : vector<16x16xf32>
    %cst_38 = arith.constant dense<0.000000e+00> : vector<16xf32>
    %123 = vector.multi_reduction <add>, %122, %cst_38 [1] : vector<16x16xf32> to vector<16xf32>
    %124 = vector.shape_cast %123 : vector<16xf32> to vector<16x1xf32>
    %125 = tpu.reciprocal %124 {approx = true} : vector<16x1xf32> -> vector<16x1xf32>
    %126 = vector.broadcast %125 : vector<16x1xf32> to vector<16x16xf32>
    %127 = arith.mulf %122, %126 : vector<16x16xf32>
    %128 = vector.extract_strided_slice %43 {offsets = [0, 96], sizes = [16, 32], strides = [1, 1]} : vector<16x128xf32> to vector<16x32xf32>
    %129 = arith.truncf %127 : vector<16x16xf32> to vector<16x16xbf16>
    %130 = arith.truncf %128 : vector<16x32xf32> to vector<16x32xbf16>
    %cst_39 = arith.constant dense<0.000000e+00> : vector<16x32xf32>
    %131 = tpu.matmul %129, %130, %cst_39 {dimension_numbers = #tpu.dot_dimension_numbers<[1], [0], [0], [1], [0, 0, 1, 1], [], []>} : vector<16x16xbf16>, vector<16x32xbf16>, vector<16x32xf32> -> vector<16x32xf32>
    %132 = tpu.concatenate %65, %87, %109, %131 in 1 : vector<16x32xf32>, vector<16x32xf32>, vector<16x32xf32>, vector<16x32xf32> -> vector<16x128xf32>
    %c384 = arith.constant 384 : index
    %c0_40 = arith.constant 0 : index
    %133 = vector.load %arg4[%c384, %c0_40] : memref<1792x128xbf16, #tpu.memory_space<vmem>>, vector<128x128xbf16>
    %134 = arith.truncf %132 : vector<16x128xf32> to vector<16x128xbf16>
    %cst_41 = arith.constant dense<0.000000e+00> : vector<16x128xf32>
    %135 = tpu.matmul %134, %133, %cst_41 {dimension_numbers = #tpu.dot_dimension_numbers<[1], [0], [0], [1], [0, 0, 1, 1], [], []>} : vector<16x128xbf16>, vector<128x128xbf16>, vector<16x128xf32> -> vector<16x128xf32>
    %c5 = arith.constant 5 : index
    %c0_42 = arith.constant 0 : index
    %136 = vector.load %arg3[%c5, %c0_42] : memref<26x128xf32, #tpu.memory_space<vmem>>, vector<1x128xf32>
    %137 = vector.broadcast %136 : vector<1x128xf32> to vector<16x128xf32>
    %138 = arith.addf %135, %137 : vector<16x128xf32>
    %139 = arith.addf %25, %138 : vector<16x128xf32>
    %c6 = arith.constant 6 : index
    %c0_43 = arith.constant 0 : index
    %140 = vector.load %arg3[%c6, %c0_43] : memref<26x128xf32, #tpu.memory_space<vmem>>, vector<1x128xf32>
    %c7 = arith.constant 7 : index
    %c0_44 = arith.constant 0 : index
    %141 = vector.load %arg3[%c7, %c0_44] : memref<26x128xf32, #tpu.memory_space<vmem>>, vector<1x128xf32>
    %cst_45 = arith.constant dense<0.000000e+00> : vector<16xf32>
    %142 = vector.multi_reduction <add>, %139, %cst_45 [1] : vector<16x128xf32> to vector<16xf32>
    %143 = vector.shape_cast %142 : vector<16xf32> to vector<16x1xf32>
    %cst_46 = arith.constant 1.280000e+02 : f32
    %144 = vector.broadcast %cst_46 : f32 to vector<16x1xf32>
    %145 = arith.divf %143, %144 : vector<16x1xf32>
    %146 = vector.broadcast %145 : vector<16x1xf32> to vector<16x128xf32>
    %147 = arith.subf %139, %146 : vector<16x128xf32>
    %148 = arith.mulf %147, %147 : vector<16x128xf32>
    %cst_47 = arith.constant dense<0.000000e+00> : vector<16xf32>
    %149 = vector.multi_reduction <add>, %148, %cst_47 [1] : vector<16x128xf32> to vector<16xf32>
    %150 = vector.shape_cast %149 : vector<16xf32> to vector<16x1xf32>
    %cst_48 = arith.constant 1.280000e+02 : f32
    %151 = vector.broadcast %cst_48 : f32 to vector<16x1xf32>
    %152 = arith.divf %150, %151 : vector<16x1xf32>
    %153 = vector.broadcast %145 : vector<16x1xf32> to vector<16x128xf32>
    %154 = arith.subf %139, %153 : vector<16x128xf32>
    %cst_49 = arith.constant 9.99999996E-13 : f32
    %155 = vector.broadcast %cst_49 : f32 to vector<16x1xf32>
    %156 = arith.addf %152, %155 : vector<16x1xf32>
    %157 = math.rsqrt %156 : vector<16x1xf32>
    %158 = vector.broadcast %157 : vector<16x1xf32> to vector<16x128xf32>
    %159 = arith.mulf %154, %158 : vector<16x128xf32>
    %160 = vector.broadcast %140 : vector<1x128xf32> to vector<16x128xf32>
    %161 = arith.mulf %159, %160 : vector<16x128xf32>
    %162 = vector.broadcast %141 : vector<1x128xf32> to vector<16x128xf32>
    %163 = arith.addf %161, %162 : vector<16x128xf32>
    %c8 = arith.constant 8 : index
    %c0_50 = arith.constant 0 : index
    %164 = vector.load %arg3[%c8, %c0_50] : memref<26x128xf32, #tpu.memory_space<vmem>>, vector<1x128xf32>
    %c9 = arith.constant 9 : index
    %c0_51 = arith.constant 0 : index
    %165 = vector.load %arg3[%c9, %c0_51] : memref<26x128xf32, #tpu.memory_space<vmem>>, vector<1x128xf32>
    %166 = tpu.concatenate %164, %165 in 1 : vector<1x128xf32>, vector<1x128xf32> -> vector<1x256xf32>
    %c0_52 = arith.constant 0 : index
    %c0_53 = arith.constant 0 : index
    %167 = vector.load %arg5[%c0_52, %c0_53] : memref<256x256xbf16, #tpu.memory_space<vmem>>, vector<128x256xbf16>
    %168 = arith.truncf %163 : vector<16x128xf32> to vector<16x128xbf16>
    %cst_54 = arith.constant dense<0.000000e+00> : vector<16x256xf32>
    %169 = tpu.matmul %168, %167, %cst_54 {dimension_numbers = #tpu.dot_dimension_numbers<[1], [0], [0], [1], [0, 0, 1, 1], [], []>} : vector<16x128xbf16>, vector<128x256xbf16>, vector<16x256xf32> -> vector<16x256xf32>
    %170 = vector.broadcast %166 : vector<1x256xf32> to vector<16x256xf32>
    %171 = arith.addf %169, %170 : vector<16x256xf32>
    %cst_55 = arith.constant 5.000000e-01 : f32
    %172 = vector.broadcast %cst_55 : f32 to vector<16x256xf32>
    %173 = arith.mulf %172, %171 : vector<16x256xf32>
    %cst_56 = arith.constant 4.471500e-02 : f32
    %174 = vector.broadcast %cst_56 : f32 to vector<16x256xf32>
    %175 = arith.mulf %174, %171 : vector<16x256xf32>
    %176 = arith.mulf %175, %171 : vector<16x256xf32>
    %177 = arith.mulf %176, %171 : vector<16x256xf32>
    %178 = arith.addf %171, %177 : vector<16x256xf32>
    %cst_57 = arith.constant 0.797884583 : f32
    %179 = vector.broadcast %cst_57 : f32 to vector<16x256xf32>
    %180 = arith.mulf %179, %178 : vector<16x256xf32>
    %181 = math.tanh %180 : vector<16x256xf32>
    %cst_58 = arith.constant 1.000000e+00 : f32
    %182 = vector.broadcast %cst_58 : f32 to vector<16x256xf32>
    %183 = arith.addf %182, %181 : vector<16x256xf32>
    %184 = arith.mulf %173, %183 : vector<16x256xf32>
    %c512 = arith.constant 512 : index
    %c0_59 = arith.constant 0 : index
    %185 = vector.load %arg4[%c512, %c0_59] : memref<1792x128xbf16, #tpu.memory_space<vmem>>, vector<256x128xbf16>
    %186 = arith.truncf %184 : vector<16x256xf32> to vector<16x256xbf16>
    %cst_60 = arith.constant dense<0.000000e+00> : vector<16x128xf32>
    %187 = tpu.matmul %186, %185, %cst_60 {dimension_numbers = #tpu.dot_dimension_numbers<[1], [0], [0], [1], [0, 0, 1, 1], [], []>} : vector<16x256xbf16>, vector<256x128xbf16>, vector<16x128xf32> -> vector<16x128xf32>
    %c10 = arith.constant 10 : index
    %c0_61 = arith.constant 0 : index
    %188 = vector.load %arg3[%c10, %c0_61] : memref<26x128xf32, #tpu.memory_space<vmem>>, vector<1x128xf32>
    %189 = vector.broadcast %188 : vector<1x128xf32> to vector<16x128xf32>
    %190 = arith.addf %187, %189 : vector<16x128xf32>
    %191 = arith.addf %163, %190 : vector<16x128xf32>
    %c11 = arith.constant 11 : index
    %c0_62 = arith.constant 0 : index
    %192 = vector.load %arg3[%c11, %c0_62] : memref<26x128xf32, #tpu.memory_space<vmem>>, vector<1x128xf32>
    %c12 = arith.constant 12 : index
    %c0_63 = arith.constant 0 : index
    %193 = vector.load %arg3[%c12, %c0_63] : memref<26x128xf32, #tpu.memory_space<vmem>>, vector<1x128xf32>
    %cst_64 = arith.constant dense<0.000000e+00> : vector<16xf32>
    %194 = vector.multi_reduction <add>, %191, %cst_64 [1] : vector<16x128xf32> to vector<16xf32>
    %195 = vector.shape_cast %194 : vector<16xf32> to vector<16x1xf32>
    %cst_65 = arith.constant 1.280000e+02 : f32
    %196 = vector.broadcast %cst_65 : f32 to vector<16x1xf32>
    %197 = arith.divf %195, %196 : vector<16x1xf32>
    %198 = vector.broadcast %197 : vector<16x1xf32> to vector<16x128xf32>
    %199 = arith.subf %191, %198 : vector<16x128xf32>
    %200 = arith.mulf %199, %199 : vector<16x128xf32>
    %cst_66 = arith.constant dense<0.000000e+00> : vector<16xf32>
    %201 = vector.multi_reduction <add>, %200, %cst_66 [1] : vector<16x128xf32> to vector<16xf32>
    %202 = vector.shape_cast %201 : vector<16xf32> to vector<16x1xf32>
    %cst_67 = arith.constant 1.280000e+02 : f32
    %203 = vector.broadcast %cst_67 : f32 to vector<16x1xf32>
    %204 = arith.divf %202, %203 : vector<16x1xf32>
    %205 = vector.broadcast %197 : vector<16x1xf32> to vector<16x128xf32>
    %206 = arith.subf %191, %205 : vector<16x128xf32>
    %cst_68 = arith.constant 9.99999996E-13 : f32
    %207 = vector.broadcast %cst_68 : f32 to vector<16x1xf32>
    %208 = arith.addf %204, %207 : vector<16x1xf32>
    %209 = math.rsqrt %208 : vector<16x1xf32>
    %210 = vector.broadcast %209 : vector<16x1xf32> to vector<16x128xf32>
    %211 = arith.mulf %206, %210 : vector<16x128xf32>
    %212 = vector.broadcast %192 : vector<1x128xf32> to vector<16x128xf32>
    %213 = arith.mulf %211, %212 : vector<16x128xf32>
    %214 = vector.broadcast %193 : vector<1x128xf32> to vector<16x128xf32>
    %215 = arith.addf %213, %214 : vector<16x128xf32>
    %c768 = arith.constant 768 : index
    %c0_69 = arith.constant 0 : index
    %216 = vector.load %arg4[%c768, %c0_69] : memref<1792x128xbf16, #tpu.memory_space<vmem>>, vector<128x128xbf16>
    %217 = arith.truncf %215 : vector<16x128xf32> to vector<16x128xbf16>
    %cst_70 = arith.constant dense<0.000000e+00> : vector<16x128xf32>
    %218 = tpu.matmul %217, %216, %cst_70 {dimension_numbers = #tpu.dot_dimension_numbers<[1], [0], [0], [1], [0, 0, 1, 1], [], []>} : vector<16x128xbf16>, vector<128x128xbf16>, vector<16x128xf32> -> vector<16x128xf32>
    %c13 = arith.constant 13 : index
    %c0_71 = arith.constant 0 : index
    %219 = vector.load %arg3[%c13, %c0_71] : memref<26x128xf32, #tpu.memory_space<vmem>>, vector<1x128xf32>
    %220 = vector.broadcast %219 : vector<1x128xf32> to vector<16x128xf32>
    %221 = arith.addf %218, %220 : vector<16x128xf32>
    %c896 = arith.constant 896 : index
    %c0_72 = arith.constant 0 : index
    %222 = vector.load %arg4[%c896, %c0_72] : memref<1792x128xbf16, #tpu.memory_space<vmem>>, vector<128x128xbf16>
    %223 = arith.truncf %215 : vector<16x128xf32> to vector<16x128xbf16>
    %cst_73 = arith.constant dense<0.000000e+00> : vector<16x128xf32>
    %224 = tpu.matmul %223, %222, %cst_73 {dimension_numbers = #tpu.dot_dimension_numbers<[1], [0], [0], [1], [0, 0, 1, 1], [], []>} : vector<16x128xbf16>, vector<128x128xbf16>, vector<16x128xf32> -> vector<16x128xf32>
    %c14 = arith.constant 14 : index
    %c0_74 = arith.constant 0 : index
    %225 = vector.load %arg3[%c14, %c0_74] : memref<26x128xf32, #tpu.memory_space<vmem>>, vector<1x128xf32>
    %226 = vector.broadcast %225 : vector<1x128xf32> to vector<16x128xf32>
    %227 = arith.addf %224, %226 : vector<16x128xf32>
    %c1024 = arith.constant 1024 : index
    %c0_75 = arith.constant 0 : index
    %228 = vector.load %arg4[%c1024, %c0_75] : memref<1792x128xbf16, #tpu.memory_space<vmem>>, vector<128x128xbf16>
    %229 = arith.truncf %215 : vector<16x128xf32> to vector<16x128xbf16>
    %cst_76 = arith.constant dense<0.000000e+00> : vector<16x128xf32>
    %230 = tpu.matmul %229, %228, %cst_76 {dimension_numbers = #tpu.dot_dimension_numbers<[1], [0], [0], [1], [0, 0, 1, 1], [], []>} : vector<16x128xbf16>, vector<128x128xbf16>, vector<16x128xf32> -> vector<16x128xf32>
    %c15 = arith.constant 15 : index
    %c0_77 = arith.constant 0 : index
    %231 = vector.load %arg3[%c15, %c0_77] : memref<26x128xf32, #tpu.memory_space<vmem>>, vector<1x128xf32>
    %232 = vector.broadcast %231 : vector<1x128xf32> to vector<16x128xf32>
    %233 = arith.addf %230, %232 : vector<16x128xf32>
    %234 = vector.extract_strided_slice %221 {offsets = [0, 0], sizes = [16, 32], strides = [1, 1]} : vector<16x128xf32> to vector<16x32xf32>
    %235 = vector.extract_strided_slice %227 {offsets = [0, 0], sizes = [16, 32], strides = [1, 1]} : vector<16x128xf32> to vector<16x32xf32>
    %236 = arith.truncf %234 : vector<16x32xf32> to vector<16x32xbf16>
    %237 = arith.truncf %235 : vector<16x32xf32> to vector<16x32xbf16>
    %cst_78 = arith.constant dense<0.000000e+00> : vector<16x16xf32>
    %238 = tpu.matmul %236, %237, %cst_78 {dimension_numbers = #tpu.dot_dimension_numbers<[1], [1], [0], [0], [0, 0, 1, 0], [], []>} : vector<16x32xbf16>, vector<16x32xbf16>, vector<16x16xf32> -> vector<16x16xf32>
    %cst_79 = arith.constant 0.176776692 : f32
    %239 = vector.broadcast %cst_79 : f32 to vector<16x16xf32>
    %240 = arith.mulf %238, %239 : vector<16x16xf32>
    %241 = arith.addf %240, %0 : vector<16x16xf32>
    %cst_80 = arith.constant dense<0xFF800000> : vector<16xf32>
    %242 = vector.multi_reduction <maximumf>, %241, %cst_80 [1] : vector<16x16xf32> to vector<16xf32>
    %243 = vector.shape_cast %242 : vector<16xf32> to vector<16x1xf32>
    %244 = vector.broadcast %243 : vector<16x1xf32> to vector<16x16xf32>
    %245 = arith.subf %241, %244 : vector<16x16xf32>
    %246 = math.exp %245 : vector<16x16xf32>
    %cst_81 = arith.constant dense<0.000000e+00> : vector<16xf32>
    %247 = vector.multi_reduction <add>, %246, %cst_81 [1] : vector<16x16xf32> to vector<16xf32>
    %248 = vector.shape_cast %247 : vector<16xf32> to vector<16x1xf32>
    %249 = tpu.reciprocal %248 {approx = true} : vector<16x1xf32> -> vector<16x1xf32>
    %250 = vector.broadcast %249 : vector<16x1xf32> to vector<16x16xf32>
    %251 = arith.mulf %246, %250 : vector<16x16xf32>
    %252 = vector.extract_strided_slice %233 {offsets = [0, 0], sizes = [16, 32], strides = [1, 1]} : vector<16x128xf32> to vector<16x32xf32>
    %253 = arith.truncf %251 : vector<16x16xf32> to vector<16x16xbf16>
    %254 = arith.truncf %252 : vector<16x32xf32> to vector<16x32xbf16>
    %cst_82 = arith.constant dense<0.000000e+00> : vector<16x32xf32>
    %255 = tpu.matmul %253, %254, %cst_82 {dimension_numbers = #tpu.dot_dimension_numbers<[1], [0], [0], [1], [0, 0, 1, 1], [], []>} : vector<16x16xbf16>, vector<16x32xbf16>, vector<16x32xf32> -> vector<16x32xf32>
    %256 = vector.extract_strided_slice %221 {offsets = [0, 32], sizes = [16, 32], strides = [1, 1]} : vector<16x128xf32> to vector<16x32xf32>
    %257 = vector.extract_strided_slice %227 {offsets = [0, 32], sizes = [16, 32], strides = [1, 1]} : vector<16x128xf32> to vector<16x32xf32>
    %258 = arith.truncf %256 : vector<16x32xf32> to vector<16x32xbf16>
    %259 = arith.truncf %257 : vector<16x32xf32> to vector<16x32xbf16>
    %cst_83 = arith.constant dense<0.000000e+00> : vector<16x16xf32>
    %260 = tpu.matmul %258, %259, %cst_83 {dimension_numbers = #tpu.dot_dimension_numbers<[1], [1], [0], [0], [0, 0, 1, 0], [], []>} : vector<16x32xbf16>, vector<16x32xbf16>, vector<16x16xf32> -> vector<16x16xf32>
    %cst_84 = arith.constant 0.176776692 : f32
    %261 = vector.broadcast %cst_84 : f32 to vector<16x16xf32>
    %262 = arith.mulf %260, %261 : vector<16x16xf32>
    %263 = arith.addf %262, %0 : vector<16x16xf32>
    %cst_85 = arith.constant dense<0xFF800000> : vector<16xf32>
    %264 = vector.multi_reduction <maximumf>, %263, %cst_85 [1] : vector<16x16xf32> to vector<16xf32>
    %265 = vector.shape_cast %264 : vector<16xf32> to vector<16x1xf32>
    %266 = vector.broadcast %265 : vector<16x1xf32> to vector<16x16xf32>
    %267 = arith.subf %263, %266 : vector<16x16xf32>
    %268 = math.exp %267 : vector<16x16xf32>
    %cst_86 = arith.constant dense<0.000000e+00> : vector<16xf32>
    %269 = vector.multi_reduction <add>, %268, %cst_86 [1] : vector<16x16xf32> to vector<16xf32>
    %270 = vector.shape_cast %269 : vector<16xf32> to vector<16x1xf32>
    %271 = tpu.reciprocal %270 {approx = true} : vector<16x1xf32> -> vector<16x1xf32>
    %272 = vector.broadcast %271 : vector<16x1xf32> to vector<16x16xf32>
    %273 = arith.mulf %268, %272 : vector<16x16xf32>
    %274 = vector.extract_strided_slice %233 {offsets = [0, 32], sizes = [16, 32], strides = [1, 1]} : vector<16x128xf32> to vector<16x32xf32>
    %275 = arith.truncf %273 : vector<16x16xf32> to vector<16x16xbf16>
    %276 = arith.truncf %274 : vector<16x32xf32> to vector<16x32xbf16>
    %cst_87 = arith.constant dense<0.000000e+00> : vector<16x32xf32>
    %277 = tpu.matmul %275, %276, %cst_87 {dimension_numbers = #tpu.dot_dimension_numbers<[1], [0], [0], [1], [0, 0, 1, 1], [], []>} : vector<16x16xbf16>, vector<16x32xbf16>, vector<16x32xf32> -> vector<16x32xf32>
    %278 = vector.extract_strided_slice %221 {offsets = [0, 64], sizes = [16, 32], strides = [1, 1]} : vector<16x128xf32> to vector<16x32xf32>
    %279 = vector.extract_strided_slice %227 {offsets = [0, 64], sizes = [16, 32], strides = [1, 1]} : vector<16x128xf32> to vector<16x32xf32>
    %280 = arith.truncf %278 : vector<16x32xf32> to vector<16x32xbf16>
    %281 = arith.truncf %279 : vector<16x32xf32> to vector<16x32xbf16>
    %cst_88 = arith.constant dense<0.000000e+00> : vector<16x16xf32>
    %282 = tpu.matmul %280, %281, %cst_88 {dimension_numbers = #tpu.dot_dimension_numbers<[1], [1], [0], [0], [0, 0, 1, 0], [], []>} : vector<16x32xbf16>, vector<16x32xbf16>, vector<16x16xf32> -> vector<16x16xf32>
    %cst_89 = arith.constant 0.176776692 : f32
    %283 = vector.broadcast %cst_89 : f32 to vector<16x16xf32>
    %284 = arith.mulf %282, %283 : vector<16x16xf32>
    %285 = arith.addf %284, %0 : vector<16x16xf32>
    %cst_90 = arith.constant dense<0xFF800000> : vector<16xf32>
    %286 = vector.multi_reduction <maximumf>, %285, %cst_90 [1] : vector<16x16xf32> to vector<16xf32>
    %287 = vector.shape_cast %286 : vector<16xf32> to vector<16x1xf32>
    %288 = vector.broadcast %287 : vector<16x1xf32> to vector<16x16xf32>
    %289 = arith.subf %285, %288 : vector<16x16xf32>
    %290 = math.exp %289 : vector<16x16xf32>
    %cst_91 = arith.constant dense<0.000000e+00> : vector<16xf32>
    %291 = vector.multi_reduction <add>, %290, %cst_91 [1] : vector<16x16xf32> to vector<16xf32>
    %292 = vector.shape_cast %291 : vector<16xf32> to vector<16x1xf32>
    %293 = tpu.reciprocal %292 {approx = true} : vector<16x1xf32> -> vector<16x1xf32>
    %294 = vector.broadcast %293 : vector<16x1xf32> to vector<16x16xf32>
    %295 = arith.mulf %290, %294 : vector<16x16xf32>
    %296 = vector.extract_strided_slice %233 {offsets = [0, 64], sizes = [16, 32], strides = [1, 1]} : vector<16x128xf32> to vector<16x32xf32>
    %297 = arith.truncf %295 : vector<16x16xf32> to vector<16x16xbf16>
    %298 = arith.truncf %296 : vector<16x32xf32> to vector<16x32xbf16>
    %cst_92 = arith.constant dense<0.000000e+00> : vector<16x32xf32>
    %299 = tpu.matmul %297, %298, %cst_92 {dimension_numbers = #tpu.dot_dimension_numbers<[1], [0], [0], [1], [0, 0, 1, 1], [], []>} : vector<16x16xbf16>, vector<16x32xbf16>, vector<16x32xf32> -> vector<16x32xf32>
    %300 = vector.extract_strided_slice %221 {offsets = [0, 96], sizes = [16, 32], strides = [1, 1]} : vector<16x128xf32> to vector<16x32xf32>
    %301 = vector.extract_strided_slice %227 {offsets = [0, 96], sizes = [16, 32], strides = [1, 1]} : vector<16x128xf32> to vector<16x32xf32>
    %302 = arith.truncf %300 : vector<16x32xf32> to vector<16x32xbf16>
    %303 = arith.truncf %301 : vector<16x32xf32> to vector<16x32xbf16>
    %cst_93 = arith.constant dense<0.000000e+00> : vector<16x16xf32>
    %304 = tpu.matmul %302, %303, %cst_93 {dimension_numbers = #tpu.dot_dimension_numbers<[1], [1], [0], [0], [0, 0, 1, 0], [], []>} : vector<16x32xbf16>, vector<16x32xbf16>, vector<16x16xf32> -> vector<16x16xf32>
    %cst_94 = arith.constant 0.176776692 : f32
    %305 = vector.broadcast %cst_94 : f32 to vector<16x16xf32>
    %306 = arith.mulf %304, %305 : vector<16x16xf32>
    %307 = arith.addf %306, %0 : vector<16x16xf32>
    %cst_95 = arith.constant dense<0xFF800000> : vector<16xf32>
    %308 = vector.multi_reduction <maximumf>, %307, %cst_95 [1] : vector<16x16xf32> to vector<16xf32>
    %309 = vector.shape_cast %308 : vector<16xf32> to vector<16x1xf32>
    %310 = vector.broadcast %309 : vector<16x1xf32> to vector<16x16xf32>
    %311 = arith.subf %307, %310 : vector<16x16xf32>
    %312 = math.exp %311 : vector<16x16xf32>
    %cst_96 = arith.constant dense<0.000000e+00> : vector<16xf32>
    %313 = vector.multi_reduction <add>, %312, %cst_96 [1] : vector<16x16xf32> to vector<16xf32>
    %314 = vector.shape_cast %313 : vector<16xf32> to vector<16x1xf32>
    %315 = tpu.reciprocal %314 {approx = true} : vector<16x1xf32> -> vector<16x1xf32>
    %316 = vector.broadcast %315 : vector<16x1xf32> to vector<16x16xf32>
    %317 = arith.mulf %312, %316 : vector<16x16xf32>
    %318 = vector.extract_strided_slice %233 {offsets = [0, 96], sizes = [16, 32], strides = [1, 1]} : vector<16x128xf32> to vector<16x32xf32>
    %319 = arith.truncf %317 : vector<16x16xf32> to vector<16x16xbf16>
    %320 = arith.truncf %318 : vector<16x32xf32> to vector<16x32xbf16>
    %cst_97 = arith.constant dense<0.000000e+00> : vector<16x32xf32>
    %321 = tpu.matmul %319, %320, %cst_97 {dimension_numbers = #tpu.dot_dimension_numbers<[1], [0], [0], [1], [0, 0, 1, 1], [], []>} : vector<16x16xbf16>, vector<16x32xbf16>, vector<16x32xf32> -> vector<16x32xf32>
    %322 = tpu.concatenate %255, %277, %299, %321 in 1 : vector<16x32xf32>, vector<16x32xf32>, vector<16x32xf32>, vector<16x32xf32> -> vector<16x128xf32>
    %c1152 = arith.constant 1152 : index
    %c0_98 = arith.constant 0 : index
    %323 = vector.load %arg4[%c1152, %c0_98] : memref<1792x128xbf16, #tpu.memory_space<vmem>>, vector<128x128xbf16>
    %324 = arith.truncf %322 : vector<16x128xf32> to vector<16x128xbf16>
    %cst_99 = arith.constant dense<0.000000e+00> : vector<16x128xf32>
    %325 = tpu.matmul %324, %323, %cst_99 {dimension_numbers = #tpu.dot_dimension_numbers<[1], [0], [0], [1], [0, 0, 1, 1], [], []>} : vector<16x128xbf16>, vector<128x128xbf16>, vector<16x128xf32> -> vector<16x128xf32>
    %c16 = arith.constant 16 : index
    %c0_100 = arith.constant 0 : index
    %326 = vector.load %arg3[%c16, %c0_100] : memref<26x128xf32, #tpu.memory_space<vmem>>, vector<1x128xf32>
    %327 = vector.broadcast %326 : vector<1x128xf32> to vector<16x128xf32>
    %328 = arith.addf %325, %327 : vector<16x128xf32>
    %329 = arith.addf %215, %328 : vector<16x128xf32>
    %c17 = arith.constant 17 : index
    %c0_101 = arith.constant 0 : index
    %330 = vector.load %arg3[%c17, %c0_101] : memref<26x128xf32, #tpu.memory_space<vmem>>, vector<1x128xf32>
    %c18 = arith.constant 18 : index
    %c0_102 = arith.constant 0 : index
    %331 = vector.load %arg3[%c18, %c0_102] : memref<26x128xf32, #tpu.memory_space<vmem>>, vector<1x128xf32>
    %cst_103 = arith.constant dense<0.000000e+00> : vector<16xf32>
    %332 = vector.multi_reduction <add>, %329, %cst_103 [1] : vector<16x128xf32> to vector<16xf32>
    %333 = vector.shape_cast %332 : vector<16xf32> to vector<16x1xf32>
    %cst_104 = arith.constant 1.280000e+02 : f32
    %334 = vector.broadcast %cst_104 : f32 to vector<16x1xf32>
    %335 = arith.divf %333, %334 : vector<16x1xf32>
    %336 = vector.broadcast %335 : vector<16x1xf32> to vector<16x128xf32>
    %337 = arith.subf %329, %336 : vector<16x128xf32>
    %338 = arith.mulf %337, %337 : vector<16x128xf32>
    %cst_105 = arith.constant dense<0.000000e+00> : vector<16xf32>
    %339 = vector.multi_reduction <add>, %338, %cst_105 [1] : vector<16x128xf32> to vector<16xf32>
    %340 = vector.shape_cast %339 : vector<16xf32> to vector<16x1xf32>
    %cst_106 = arith.constant 1.280000e+02 : f32
    %341 = vector.broadcast %cst_106 : f32 to vector<16x1xf32>
    %342 = arith.divf %340, %341 : vector<16x1xf32>
    %343 = vector.broadcast %335 : vector<16x1xf32> to vector<16x128xf32>
    %344 = arith.subf %329, %343 : vector<16x128xf32>
    %cst_107 = arith.constant 9.99999996E-13 : f32
    %345 = vector.broadcast %cst_107 : f32 to vector<16x1xf32>
    %346 = arith.addf %342, %345 : vector<16x1xf32>
    %347 = math.rsqrt %346 : vector<16x1xf32>
    %348 = vector.broadcast %347 : vector<16x1xf32> to vector<16x128xf32>
    %349 = arith.mulf %344, %348 : vector<16x128xf32>
    %350 = vector.broadcast %330 : vector<1x128xf32> to vector<16x128xf32>
    %351 = arith.mulf %349, %350 : vector<16x128xf32>
    %352 = vector.broadcast %331 : vector<1x128xf32> to vector<16x128xf32>
    %353 = arith.addf %351, %352 : vector<16x128xf32>
    %c19 = arith.constant 19 : index
    %c0_108 = arith.constant 0 : index
    %354 = vector.load %arg3[%c19, %c0_108] : memref<26x128xf32, #tpu.memory_space<vmem>>, vector<1x128xf32>
    %c20 = arith.constant 20 : index
    %c0_109 = arith.constant 0 : index
    %355 = vector.load %arg3[%c20, %c0_109] : memref<26x128xf32, #tpu.memory_space<vmem>>, vector<1x128xf32>
    %356 = tpu.concatenate %354, %355 in 1 : vector<1x128xf32>, vector<1x128xf32> -> vector<1x256xf32>
    %c128_110 = arith.constant 128 : index
    %c0_111 = arith.constant 0 : index
    %357 = vector.load %arg5[%c128_110, %c0_111] : memref<256x256xbf16, #tpu.memory_space<vmem>>, vector<128x256xbf16>
    %358 = arith.truncf %353 : vector<16x128xf32> to vector<16x128xbf16>
    %cst_112 = arith.constant dense<0.000000e+00> : vector<16x256xf32>
    %359 = tpu.matmul %358, %357, %cst_112 {dimension_numbers = #tpu.dot_dimension_numbers<[1], [0], [0], [1], [0, 0, 1, 1], [], []>} : vector<16x128xbf16>, vector<128x256xbf16>, vector<16x256xf32> -> vector<16x256xf32>
    %360 = vector.broadcast %356 : vector<1x256xf32> to vector<16x256xf32>
    %361 = arith.addf %359, %360 : vector<16x256xf32>
    %cst_113 = arith.constant 5.000000e-01 : f32
    %362 = vector.broadcast %cst_113 : f32 to vector<16x256xf32>
    %363 = arith.mulf %362, %361 : vector<16x256xf32>
    %cst_114 = arith.constant 4.471500e-02 : f32
    %364 = vector.broadcast %cst_114 : f32 to vector<16x256xf32>
    %365 = arith.mulf %364, %361 : vector<16x256xf32>
    %366 = arith.mulf %365, %361 : vector<16x256xf32>
    %367 = arith.mulf %366, %361 : vector<16x256xf32>
    %368 = arith.addf %361, %367 : vector<16x256xf32>
    %cst_115 = arith.constant 0.797884583 : f32
    %369 = vector.broadcast %cst_115 : f32 to vector<16x256xf32>
    %370 = arith.mulf %369, %368 : vector<16x256xf32>
    %371 = math.tanh %370 : vector<16x256xf32>
    %cst_116 = arith.constant 1.000000e+00 : f32
    %372 = vector.broadcast %cst_116 : f32 to vector<16x256xf32>
    %373 = arith.addf %372, %371 : vector<16x256xf32>
    %374 = arith.mulf %363, %373 : vector<16x256xf32>
    %c1280 = arith.constant 1280 : index
    %c0_117 = arith.constant 0 : index
    %375 = vector.load %arg4[%c1280, %c0_117] : memref<1792x128xbf16, #tpu.memory_space<vmem>>, vector<256x128xbf16>
    %376 = arith.truncf %374 : vector<16x256xf32> to vector<16x256xbf16>
    %cst_118 = arith.constant dense<0.000000e+00> : vector<16x128xf32>
    %377 = tpu.matmul %376, %375, %cst_118 {dimension_numbers = #tpu.dot_dimension_numbers<[1], [0], [0], [1], [0, 0, 1, 1], [], []>} : vector<16x256xbf16>, vector<256x128xbf16>, vector<16x128xf32> -> vector<16x128xf32>
    %c21 = arith.constant 21 : index
    %c0_119 = arith.constant 0 : index
    %378 = vector.load %arg3[%c21, %c0_119] : memref<26x128xf32, #tpu.memory_space<vmem>>, vector<1x128xf32>
    %379 = vector.broadcast %378 : vector<1x128xf32> to vector<16x128xf32>
    %380 = arith.addf %377, %379 : vector<16x128xf32>
    %381 = arith.addf %353, %380 : vector<16x128xf32>
    %c22 = arith.constant 22 : index
    %c0_120 = arith.constant 0 : index
    %382 = vector.load %arg3[%c22, %c0_120] : memref<26x128xf32, #tpu.memory_space<vmem>>, vector<1x128xf32>
    %c23 = arith.constant 23 : index
    %c0_121 = arith.constant 0 : index
    %383 = vector.load %arg3[%c23, %c0_121] : memref<26x128xf32, #tpu.memory_space<vmem>>, vector<1x128xf32>
    %cst_122 = arith.constant dense<0.000000e+00> : vector<16xf32>
    %384 = vector.multi_reduction <add>, %381, %cst_122 [1] : vector<16x128xf32> to vector<16xf32>
    %385 = vector.shape_cast %384 : vector<16xf32> to vector<16x1xf32>
    %cst_123 = arith.constant 1.280000e+02 : f32
    %386 = vector.broadcast %cst_123 : f32 to vector<16x1xf32>
    %387 = arith.divf %385, %386 : vector<16x1xf32>
    %388 = vector.broadcast %387 : vector<16x1xf32> to vector<16x128xf32>
    %389 = arith.subf %381, %388 : vector<16x128xf32>
    %390 = arith.mulf %389, %389 : vector<16x128xf32>
    %cst_124 = arith.constant dense<0.000000e+00> : vector<16xf32>
    %391 = vector.multi_reduction <add>, %390, %cst_124 [1] : vector<16x128xf32> to vector<16xf32>
    %392 = vector.shape_cast %391 : vector<16xf32> to vector<16x1xf32>
    %cst_125 = arith.constant 1.280000e+02 : f32
    %393 = vector.broadcast %cst_125 : f32 to vector<16x1xf32>
    %394 = arith.divf %392, %393 : vector<16x1xf32>
    %395 = vector.broadcast %387 : vector<16x1xf32> to vector<16x128xf32>
    %396 = arith.subf %381, %395 : vector<16x128xf32>
    %cst_126 = arith.constant 9.99999996E-13 : f32
    %397 = vector.broadcast %cst_126 : f32 to vector<16x1xf32>
    %398 = arith.addf %394, %397 : vector<16x1xf32>
    %399 = math.rsqrt %398 : vector<16x1xf32>
    %400 = vector.broadcast %399 : vector<16x1xf32> to vector<16x128xf32>
    %401 = arith.mulf %396, %400 : vector<16x128xf32>
    %402 = vector.broadcast %382 : vector<1x128xf32> to vector<16x128xf32>
    %403 = arith.mulf %401, %402 : vector<16x128xf32>
    %404 = vector.broadcast %383 : vector<1x128xf32> to vector<16x128xf32>
    %405 = arith.addf %403, %404 : vector<16x128xf32>
    %c1536 = arith.constant 1536 : index
    %c0_127 = arith.constant 0 : index
    %406 = vector.load %arg4[%c1536, %c0_127] : memref<1792x128xbf16, #tpu.memory_space<vmem>>, vector<128x128xbf16>
    %407 = arith.truncf %405 : vector<16x128xf32> to vector<16x128xbf16>
    %cst_128 = arith.constant dense<0.000000e+00> : vector<16x128xf32>
    %408 = tpu.matmul %407, %406, %cst_128 {dimension_numbers = #tpu.dot_dimension_numbers<[1], [0], [0], [1], [0, 0, 1, 1], [], []>} : vector<16x128xbf16>, vector<128x128xbf16>, vector<16x128xf32> -> vector<16x128xf32>
    %c24 = arith.constant 24 : index
    %c0_129 = arith.constant 0 : index
    %409 = vector.load %arg3[%c24, %c0_129] : memref<26x128xf32, #tpu.memory_space<vmem>>, vector<1x128xf32>
    %410 = vector.broadcast %409 : vector<1x128xf32> to vector<16x128xf32>
    %411 = arith.addf %408, %410 : vector<16x128xf32>
    %412 = math.tanh %411 : vector<16x128xf32>
    %c1664 = arith.constant 1664 : index
    %c0_130 = arith.constant 0 : index
    %413 = vector.load %arg4[%c1664, %c0_130] : memref<1792x128xbf16, #tpu.memory_space<vmem>>, vector<128x128xbf16>
    %414 = arith.truncf %412 : vector<16x128xf32> to vector<16x128xbf16>
    %cst_131 = arith.constant dense<0.000000e+00> : vector<16x128xf32>
    %415 = tpu.matmul %414, %413, %cst_131 {dimension_numbers = #tpu.dot_dimension_numbers<[1], [0], [0], [1], [0, 0, 1, 1], [], []>} : vector<16x128xbf16>, vector<128x128xbf16>, vector<16x128xf32> -> vector<16x128xf32>
    %c25 = arith.constant 25 : index
    %c0_132 = arith.constant 0 : index
    %416 = vector.load %arg3[%c25, %c0_132] : memref<26x128xf32, #tpu.memory_space<vmem>>, vector<1x128xf32>
    %417 = vector.broadcast %416 : vector<1x128xf32> to vector<16x128xf32>
    %418 = arith.addf %415, %417 : vector<16x128xf32>
    %c0_133 = arith.constant 0 : index
    %c0_134 = arith.constant 0 : index
    %419 = vector.load %arg6[%c0_133, %c0_134] : memref<16x128xf32, #tpu.memory_space<vmem>>, vector<16x128xf32>
    tpu.vector_store %arg6[%c0_133, %c0_134], %418 {strides = array<i32>} : memref<16x128xf32, #tpu.memory_space<vmem>>, vector<16x128xf32>,
    return
  }
  func.func @transform_0(%arg0: i32) -> (i32, i32) {
    %c0_i32 = arith.constant 0 : i32
    %c0_i32_0 = arith.constant 0 : i32
    return %arg0, %c0_i32 : i32, i32
  }
  func.func @transform_1(%arg0: i32) -> (i32, i32) {
    %c0_i32 = arith.constant 0 : i32
    %c0_i32_0 = arith.constant 0 : i32
    return %arg0, %c0_i32 : i32, i32
  }
  func.func @transform_2(%arg0: i32) -> (i32, i32) {
    %c0_i32 = arith.constant 0 : i32
    %c0_i32_0 = arith.constant 0 : i32
    %c0_i32_1 = arith.constant 0 : i32
    return %c0_i32, %c0_i32_0 : i32, i32
  }
  func.func @transform_3(%arg0: i32) -> (i32, i32) {
    %c0_i32 = arith.constant 0 : i32
    %c0_i32_0 = arith.constant 0 : i32
    %c0_i32_1 = arith.constant 0 : i32
    return %c0_i32, %c0_i32_0 : i32, i32
  }
  func.func @transform_4(%arg0: i32) -> (i32, i32) {
    %c0_i32 = arith.constant 0 : i32
    %c0_i32_0 = arith.constant 0 : i32
    %c0_i32_1 = arith.constant 0 : i32
    return %c0_i32, %c0_i32_0 : i32, i32
  }
  func.func @transform_5(%arg0: i32) -> (i32, i32) {
    %c0_i32 = arith.constant 0 : i32
    %c0_i32_0 = arith.constant 0 : i32
    return %arg0, %c0_i32 : i32, i32
  }
}

</mosaic_0001>

<bundles_post_ra>
// kernel: neg.1
= control target key start
LH: loop header
LB: loop body
LE: loop exit
PB: predicated region body
PF: predicated region fallthrough
CT: control target
= control target key end

     0   :  { %s24_s0 = inlined_call_operand.vmem [shape: f32[2,4], index: 0, kind: input, shape index: {}]   ;;  %s25_s1 = inlined_call_operand.vmem [shape: f32[2,4], index: 1, kind: output, shape index: {}]  }
   0x1   :  { %v2_v0 = vld [vmem:[%s24_s0] sm:$0x3] }
   0x2   :  { %v5_v1 = vxor.u32 2147483648, %v2_v0 }
   0x4   :  { %7 = vst [vmem:[%s25_s1] sm:$0x3] %v5_v1 }

// kernel: sentiment_classifier_forward.1
= control target key start
LH: loop header
LB: loop body
LE: loop exit
PB: predicated region body
PF: predicated region fallthrough
CT: control target
= control target key end

     0   :  { %v4064_v2 = vmov 0.0   ;;  %vm4065_vm0 = vmmov 0   ;;  %vm395_vm1 = vcmask 261120   ;;  %vm447_vm2 = vcmask 130048   ;;  %s4066_s6 = smov 96   ;;  %s4067_s7 = smov 64   ;;  %s4968_s0 = inlined_call_operand.vmem [shape: f32[16,128], index: 0, kind: input, shape index: {}]   ;;  %s4969_s3 = inlined_call_operand.vmem [shape: bf16[1792,128], index: 3, kind: input, shape index: {}]   ;;  %s4970_s2 = inlined_call_operand.vmem [shape: f32[26,128], index: 2, kind: input, shape index: {}]   ;;  %s4971_s1 = inlined_call_operand.vmem [shape: f32[16,16], index: 1, kind: input, shape index: {}]   ;;  %s4972_s4 = inlined_call_operand.vmem [shape: bf16[256,256], index: 4, kind: input, shape index: {}]   ;;  %s4973_s5 = inlined_call_operand.vmem [shape: f32[16,128], index: 5, kind: output, shape index: {}]  }
   0x1   :  { %v23_v0 = vld [vmem:[%s4968_s0] sm:$0xff]  ;;  %v24_v1 = vld [vmem:[%s4968_s0 + $0x8] sm:$0xff]  ;;  %3466 = vmatprep.subr.bf16.mxu0 %v4064_v2  ;;  %v3798_v3 = vld [vmem:[%s4969_s3 + $0x38] sm:$0xff]   ;;  %3486 = vmatprep.subr.bf16.mxu1 %v4064_v2  ;;  %s4068_s8 = smov 32   ;;  %vm920_vm3 = vcmask 523264   ;;  %vm923_vm4 = vcmask 785408  }
   0x2   :  { %27 = vadd.xlane.f32.xlu0 %v23_v0  ;;  %v3799_v4 = vld [vmem:[%s4969_s3 + $0x78] sm:$0xff]   ;;  %3467 = vmatpush3.bf16.msra.mxu0 %v3798_v3  ;;  %v3800_v13 = vld [vmem:[%s4969_s3 + $0x30] sm:$0xff]   ;;  %v3802_v15 = vld [vmem:[%s4969_s3 + $0x28] sm:$0xff]  }
   0x3   :  { %3487 = vmatpush3.bf16.msra.mxu1 %v3799_v4  ;;  %3468 = vmatprep.subr.bf16.mxu0 %v4064_v2  ;;  %v3801_v14 = vld [vmem:[%s4969_s3 + $0x70] sm:$0xff]   ;;  %v3803_v16 = vld [vmem:[%s4969_s3 + $0x68] sm:$0xff]   ;;  %v3804_v17 = vld [vmem:[%s4969_s3 + $0x20] sm:$0xff]  }
   0x4   :  { %3488 = vmatprep.subr.bf16.mxu1 %v4064_v2  ;;  %v3805_v18 = vld [vmem:[%s4969_s3 + $0x60] sm:$0xff]   ;;  %3482 = vmatprep.mubr.msk.bf16.mxu0 %vm4065_vm0, %v4064_v2  ;;  %v3806_v19 = vld [vmem:[%s4969_s3 + $0x18] sm:$0xff]   ;;  %v3808_v21 = vld [vmem:[%s4969_s3 + $0x10] sm:$0xff]  }
   0x5   :  { %3502 = vmatprep.mubr.msk.bf16.mxu1 %vm4065_vm0, %v4064_v2  ;;  %v3807_v20 = vld [vmem:[%s4969_s3 + $0x58] sm:$0xff]   ;;  %v3809_v22 = vld [vmem:[%s4969_s3 + $0x50] sm:$0xff]   ;;  %v3810_v23 = vld [vmem:[%s4969_s3 + $0x8] sm:$0xff]  }
   0x6   :  { %29 = vadd.xlane.f32.xlu0 %v24_v1  ;;  %3469 = vmatpush3.bf16.msra.mxu0 %v3800_v13  ;;  %v3811_v24 = vld [vmem:[%s4969_s3 + $0x48] sm:$0xff]   ;;  %v3812_v25 = vld [vmem:[%s4969_s3] sm:$0xff]   ;;  %v3814_v43 = vld [vmem:[%s4969_s3 + $0xb8] sm:$0xff]  }
   0x7   :  { %3489 = vmatpush3.bf16.msra.mxu1 %v3801_v14  ;;  %3470 = vmatprep.subr.bf16.mxu0 %v4064_v2  ;;  %v3813_v26 = vld [vmem:[%s4969_s3 + $0x40] sm:$0xff]   ;;  %v3815_v45 = vld [vmem:[%s4969_s3 + $0xb0] sm:$0xff]   ;;  %v3816_v46 = vld [vmem:[%s4969_s3 + $0xa8] sm:$0xff]  }
   0x8   :  { %3490 = vmatprep.subr.bf16.mxu1 %v4064_v2  ;;  %v3114_v35 = vld [vmem:[%s4970_s2] ss:$0 sm:$0xff]  ;;  %v3115_v39 = vld [vmem:[%s4970_s2 + $0x1] ss:$0 sm:$0xff]  ;;  %v3818_v48 = vld [vmem:[%s4969_s3 + $0x98] sm:$0xff]  }
   0x9   :  { %v3817_v47 = vld [vmem:[%s4969_s3 + $0xa0] sm:$0xff]   ;;  %v3819_v49 = vld [vmem:[%s4969_s3 + $0x90] sm:$0xff]   ;;  %v3820_v50 = vld [vmem:[%s4969_s3 + $0x88] sm:$0xff]  }
   0xa   :  { %3471 = vmatpush3.bf16.msra.mxu0 %v3802_v15  ;;  %v3821_v51 = vld [vmem:[%s4969_s3 + $0x80] sm:$0xff]  }
   0xb   :  { %3491 = vmatpush3.bf16.msra.mxu1 %v3803_v16  ;;  %3472 = vmatprep.subr.bf16.mxu0 %v4064_v2  ;;  %v3125_v54 = vld [vmem:[%s4970_s2 + $0x3] ss:$0 sm:$0xff] }
   0xc   :  { %3492 = vmatprep.subr.bf16.mxu1 %v4064_v2  ;;  %v4258_v15 = vld [vmem:[%s4971_s1] sm:$0xff] }
   0xe   :  { %3473 = vmatpush3.bf16.msra.mxu0 %v3804_v17 }
   0xf   :  { %3493 = vmatpush3.bf16.msra.mxu1 %v3805_v18  ;;  %3474 = vmatprep.subr.bf16.mxu0 %v4064_v2 }
  0x10   :  { %3494 = vmatprep.subr.bf16.mxu1 %v4064_v2 }
  0x12   :  { %3475 = vmatpush3.bf16.msra.mxu0 %v3806_v19 }
  0x13   :  { %3495 = vmatpush3.bf16.msra.mxu1 %v3807_v20  ;;  %3476 = vmatprep.subr.bf16.mxu0 %v4064_v2  ;;  %v4264_v20 = vld [vmem:[%s4971_s1 + $0x8] sm:$0xff] }
  0x14   :  { %3496 = vmatprep.subr.bf16.mxu1 %v4064_v2 }
  0x16   :  { %3477 = vmatpush3.bf16.msra.mxu0 %v3808_v21 }
  0x17   :  { %3497 = vmatpush3.bf16.msra.mxu1 %v3809_v22  ;;  %3478 = vmatprep.subr.bf16.mxu0 %v4064_v2 }
  0x18   :  { %3498 = vmatprep.subr.bf16.mxu1 %v4064_v2 }
  0x1a   :  { %3479 = vmatpush3.bf16.msra.mxu0 %v3810_v23 }
  0x1b   :  { %3499 = vmatpush3.bf16.msra.mxu1 %v3811_v24  ;;  %3480 = vmatprep.subr.bf16.mxu0 %v4064_v2 }
  0x1c   :  { %3500 = vmatprep.subr.bf16.mxu1 %v4064_v2 }
  0x1e   :  { %3481 = vmatpush3.bf16.msra.mxu0 %v3812_v25 }
  0x1f   :  { %3501 = vmatpush3.bf16.msra.mxu1 %v3813_v26  ;;  %3506 = vmatprep.subr.bf16.mxu0 %v4064_v2 }
  0x20   :  { %3526 = vmatprep.subr.bf16.mxu1 %v4064_v2 }
  0x8b   :  { %v28_v5 = vpop.xlane.xlu0 %27 }
  0x8c   :  { %v32_v6 = vmul.f32 0.0078125, %v28_v5 }
  0x8e   :  { %v4116_v7 = vsub.f32 %v23_v0, %v32_v6 }
  0x8f   :  { %v30_v8 = vpop.xlane.xlu0 %29 }
  0x90   :  { %v33_v9 = vmul.f32 0.0078125, %v30_v8  ;;  %v36_v10 = vmul.f32 %v4116_v7, %v4116_v7 }
  0x92   :  { %v35_v11 = vsub.f32 %v24_v1, %v33_v9  ;;  %38 = vadd.xlane.f32.xlu1 %v36_v10  ;;  %v3116_v1 = vld [vmem:[%s4970_s2 + $0x2] ss:$0 sm:$0xff] }
  0x94   :  { %v37_v12 = vmul.f32 %v35_v11, %v35_v11 }
  0x96   :  { %40 = vadd.xlane.f32.xlu1 %v37_v12 }
 0x11b   :  { %v39_v27 = vpop.xlane.xlu1 %38 }
 0x11c   :  { %v42_v28 = vmul.f32 0.0078125, %v39_v27 }
 0x11e   :  { %v44_v29 = vadd.f32 1e-12, %v42_v28 }
 0x11f   :  { %v41_v30 = vpop.xlane.xlu1 %40 }
 0x120   :  { %3958 = vrsqrt.f32 %v44_v29  ;;  %v43_v31 = vmul.f32 0.0078125, %v41_v30 }
 0x122   :  { %v45_v32 = vadd.f32 1e-12, %v43_v31 }
 0x124   :  { %3960 = vrsqrt.f32 %v45_v32 }
 0x12d   :  { %v3959_v33 = vpop.eup %3958 }
 0x12e   :  { %v48_v34 = vmul.f32 %v3959_v33, %v4116_v7  ;;  %v3134_v7 = vld [vmem:[%s4970_s2 + $0x4] ss:$0 sm:$0xff] }
 0x130   :  { %v54_v38 = vmul.f32 %v3114_v35, %v48_v34 }
 0x131   :  { %v3961_v36 = vpop.eup %3960 }
 0x132   :  { %v49_v37 = vmul.f32 %v3961_v36, %v35_v11  ;;  %v4187_v41 = vadd.f32 %v3115_v39, %v54_v38 }
 0x134   :  { %v55_v40 = vmul.f32 %v3114_v35, %v49_v37 }
 0x136   :  { %v4189_v42 = vadd.f32 %v3115_v39, %v55_v40 }
 0x138   :  { %v78_v44 = vpack.c.bf16 %v4189_v42, %v4187_v41 }
 0x13a   :  { %3483 = vmatmul.mubr.bf16.vlgmr.msra.gmra.mxu0 %v78_v44  ;;  %3503 = vmatmul.mubr.bf16.vlgmr.msra.gmra.mxu1 %v78_v44 }
 0x13b   :  { %3507 = vmatpush3.bf16.msra.mxu0 %v3814_v43  ;;  %3522 = vmatprep.mubr.msk.bf16.mxu0 %vm4065_vm0, %v4064_v2 }
 0x13c   :  { %3508 = vmatprep.subr.bf16.mxu0 %v4064_v2  ;;  %3528 = vmatprep.mubr.msk.bf16.mxu1 %vm4065_vm0, %v4064_v2 }
 0x13f   :  { %3509 = vmatpush3.bf16.msra.mxu0 %v3815_v45 }
 0x140   :  { %3510 = vmatprep.subr.bf16.mxu0 %v4064_v2 }
 0x143   :  { %3511 = vmatpush3.bf16.msra.mxu0 %v3816_v46 }
 0x144   :  { %3512 = vmatprep.subr.bf16.mxu0 %v4064_v2 }
 0x147   :  { %3513 = vmatpush3.bf16.msra.mxu0 %v3817_v47 }
 0x148   :  { %3514 = vmatprep.subr.bf16.mxu0 %v4064_v2 }
 0x14b   :  { %3515 = vmatpush3.bf16.msra.mxu0 %v3818_v48 }
 0x14c   :  { %3516 = vmatprep.subr.bf16.mxu0 %v4064_v2 }
 0x14f   :  { %3517 = vmatpush3.bf16.msra.mxu0 %v3819_v49 }
 0x150   :  { %3518 = vmatprep.subr.bf16.mxu0 %v4064_v2 }
 0x153   :  { %3519 = vmatpush3.bf16.msra.mxu0 %v3820_v50 }
 0x154   :  { %3520 = vmatprep.subr.bf16.mxu0 %v4064_v2 }
 0x157   :  { %3521 = vmatpush3.bf16.msra.mxu0 %v3821_v51 }
 0x158   :  { %3574 = vmatprep.subr.bf16.mxu0 %v4064_v2 }
 0x15a   :  { %3523 = vmatmul.mubr.bf16.vlgmr.msra.gmra.mxu0 %v78_v44 }
 0x15b   :  { %3590 = vmatprep.mubr.msk.bf16.mxu0 %vm4065_vm0, %v4064_v2 }
 0x1fa   :  { %v166_v52 = vpop.f32.mrf.mxu0  ;;  %v276_v53 = vpop.f32.mrf.mxu1 }
 0x1fb   :  { %v277_v59 = vadd.f32 %v3125_v54, %v276_v53  ;;  %v167_v4 = vadd.f32 %v3116_v1, %v166_v52 }
 0x1fc   :  { %v3484_v55 = vpop.f32.mrf.mxu0  ;;  %v3504_v56 = vpop.f32.mrf.mxu1 }
 0x1fe   :  { %v169_v57 = vpop.f32.mrf.mxu0  ;;  %v279_v58 = vpop.f32.mrf.mxu1 }
 0x1ff   :  { %v280_v60 = vadd.f32 %v3125_v54, %v279_v58  ;;  %v170_v3 = vadd.f32 %v3116_v1, %v169_v57 }
 0x200   :  { %v3485_v61 = vpop.f32.mrf.mxu0  ;;  %v3505_v62 = vpop.f32.mrf.mxu1 }
 0x201   :  { %v4234_v63 = vpack.c.bf16 %v280_v60, %v277_v59  ;;  %v4242_v5 = vpack.c.bf16 %v170_v3, %v167_v4 }
 0x203   :  { %v400_v0 = vsel %vm395_vm1, %v4234_v63, 0 }
 0x204   :  { %3527 = vmatpush3.bf16.xpose.msra.mxu1 %v400_v0 }
 0x205   :  { %3532 = vmatprep.subr.bf16.mxu1 %v4064_v2 }
 0x20b   :  { %3529 = vmatmul.mubr.msk.bf16.vlgmr.msra.gmra.mxu1 %vm395_vm1, %v4242_v5 }
 0x20c   :  { %3534 = vmatprep.mubr.msk.bf16.mxu1 %vm4065_vm0, %v4064_v2 }
 0x21a   :  { %v386_v6 = vpop.f32.mrf.mxu0 }
 0x21b   :  { %v387_v10 = vadd.f32 %v3134_v7, %v386_v6 }
 0x21c   :  { %v3524_v8 = vpop.f32.mrf.mxu0 }
 0x21e   :  { %v389_v9 = vpop.f32.mrf.mxu0 }
 0x21f   :  { %v390_v11 = vadd.f32 %v3134_v7, %v389_v9 }
 0x220   :  { %v3525_v12 = vpop.f32.mrf.mxu0 }
 0x221   :  { %v4251_v13 = vpack.c.bf16 %v390_v11, %v387_v10 }
 0x223   :  { %3533 = vmatpush3.bf16.msra.mxu1 %v4251_v13 }
 0x224   :  { %3538 = vmatprep.subr.bf16.mxu1 %v4064_v2 }
 0x2cb   :  { %v436_v14 = vpop.f32.mrf.mxu1 }
 0x2cc   :  { %v443_v16 = vmul.f32 0.17677669, %v436_v14 }
 0x2cd   :  { %v3530_v17 = vpop.f32.mrf.mxu1 }
 0x2ce   :  { %v445_v18 = vadd.f32 %v443_v16, %v4258_v15 }
 0x2cf   :  { %v439_v19 = vpop.f32.mrf.mxu1 }
 0x2d0   :  { %v444_v21 = vmul.f32 0.17677669, %v439_v19  ;;  %v448_v22 = vsel %vm447_vm2, %v445_v18, -inf }
 0x2d1   :  { %449 = vmax.xlane.f32.xlu0 %v448_v22  ;;  %v3531_v23 = vpop.f32.mrf.mxu1 }
 0x2d2   :  { %v446_v24 = vadd.f32 %v444_v21, %v4264_v20 }
 0x2d4   :  { %v451_v25 = vsel %vm447_vm2, %v446_v24, -inf }
 0x2d5   :  { %452 = vmax.xlane.f32.xlu1 %v451_v25 }
 0x35a   :  { %v450_v26 = vpop.xlane.xlu0 %449 }
 0x35b   :  { %v454_v27 = vsub.f32 %v445_v18, %v450_v26 }
 0x35d   :  { %v456_v28 = vmul.f32 1.442695, %v454_v27 }
 0x35e   :  { %v453_v29 = vpop.xlane.xlu1 %452 }
 0x35f   :  { %3962 = vpow2.f32 %v456_v28  ;;  %v455_v30 = vsub.f32 %v446_v24, %v453_v29 }
 0x361   :  { %v458_v31 = vmul.f32 1.442695, %v455_v30 }
 0x363   :  { %3964 = vpow2.f32 %v458_v31 }
 0x36c   :  { %v3963_v32 = vpop.eup %3962 }
 0x36d   :  { %v460_v33 = vsel %vm447_vm2, %v3963_v32, 0.0 }
 0x36e   :  { %461 = vadd.xlane.f32.xlu0 %v460_v33 }
 0x370   :  { %v3965_v34 = vpop.eup %3964 }
 0x371   :  { %v463_v35 = vsel %vm447_vm2, %v3965_v34, 0.0 }
 0x372   :  { %464 = vadd.xlane.f32.xlu1 %v463_v35 }
 0x383   :  { %517 = vrot.lane.b32.xlu1 %v4242_v5, %s4066_s6 }
 0x384   :  { %520 = vrot.lane.b32.xlu0 %v4234_v63, %s4066_s6 }
 0x3f7   :  { %v462_v36 = vpop.xlane.xlu0 %461 }
 0x3f8   :  { %3966 = vrcp.f32 %v462_v36 }
 0x3fb   :  { %v465_v37 = vpop.xlane.xlu1 %464  ;;  %v521_v44 = vpop.permute.xlu0 %520 }
 0x3fc   :  { %3968 = vrcp.f32 %v465_v37  ;;  %v526_v46 = vsel %vm395_vm1, %v521_v44, 0 }
 0x3ff   :  { %v518_v47 = vpop.permute.xlu1 %517 }
 0x405   :  { %v3967_v38 = vpop.eup %3966 }
 0x406   :  { %v468_v40 = vmul.f32 %v3967_v38, %v3963_v32 }
 0x409   :  { %v3969_v39 = vpop.eup %3968 }
 0x40a   :  { %v469_v43 = vmul.f32 %v3969_v39, %v3965_v34 }
 0x40c   :  { %v470_v45 = vpack.c.bf16 %v469_v43, %v468_v40 }
 0x40e   :  { %3535 = vmatmul.mubr.msk.bf16.vlgmr.msra.gmra.mxu1 %vm447_vm2, %v470_v45 }
 0x40f   :  { %3539 = vmatpush3.bf16.xpose.msra.mxu1 %v526_v46  ;;  %3540 = vmatprep.mubr.msk.bf16.mxu1 %vm4065_vm0, %v4064_v2 }
 0x410   :  { %3544 = vmatprep.subr.bf16.mxu1 %v4064_v2 }
 0x416   :  { %3541 = vmatmul.mubr.msk.bf16.vlgmr.msra.gmra.mxu1 %vm395_vm1, %v518_v47 }
 0x417   :  { %3546 = vmatprep.mubr.msk.bf16.mxu1 %vm4065_vm0, %v4064_v2 }
 0x4ce   :  { %v4283_v48 = vpop.f32.mrf.mxu1 }
 0x4d0   :  { %v3536_v49 = vpop.f32.mrf.mxu1 }
 0x4d2   :  { %v4285_v50 = vpop.f32.mrf.mxu1 }
 0x4d4   :  { %v3537_v51 = vpop.f32.mrf.mxu1 }
 0x4d6   :  { %v562_v52 = vpop.f32.mrf.mxu1 }
 0x4d7   :  { %v569_v53 = vmul.f32 0.17677669, %v562_v52 }
 0x4d8   :  { %v3542_v54 = vpop.f32.mrf.mxu1 }
 0x4d9   :  { %v571_v55 = vadd.f32 %v569_v53, %v4258_v15 }
 0x4da   :  { %v565_v56 = vpop.f32.mrf.mxu1 }
 0x4db   :  { %v570_v57 = vmul.f32 0.17677669, %v565_v56  ;;  %v573_v58 = vsel %vm447_vm2, %v571_v55, -inf }
 0x4dc   :  { %574 = vmax.xlane.f32.xlu1 %v573_v58  ;;  %v3543_v59 = vpop.f32.mrf.mxu1 }
 0x4dd   :  { %v572_v60 = vadd.f32 %v570_v57, %v4264_v20 }
 0x4df   :  { %v576_v61 = vsel %vm447_vm2, %v572_v60, -inf }
 0x4e0   :  { %577 = vmax.xlane.f32.xlu0 %v576_v61 }
 0x565   :  { %v575_v62 = vpop.xlane.xlu1 %574 }
 0x566   :  { %v579_v0 = vsub.f32 %v571_v55, %v575_v62 }
 0x568   :  { %v581_v1 = vmul.f32 1.442695, %v579_v0 }
 0x569   :  { %v578_v3 = vpop.xlane.xlu0 %577 }
 0x56a   :  { %3970 = vpow2.f32 %v581_v1  ;;  %v580_v4 = vsub.f32 %v572_v60, %v578_v3 }
 0x56c   :  { %v583_v6 = vmul.f32 1.442695, %v580_v4 }
 0x56e   :  { %3972 = vpow2.f32 %v583_v6 }
 0x577   :  { %v3971_v7 = vpop.eup %3970 }
 0x578   :  { %v585_v8 = vsel %vm447_vm2, %v3971_v7, 0.0 }
 0x579   :  { %586 = vadd.xlane.f32.xlu0 %v585_v8 }
 0x57b   :  { %v3973_v9 = vpop.eup %3972 }
 0x57c   :  { %v588_v10 = vsel %vm447_vm2, %v3973_v9, 0.0 }
 0x57d   :  { %589 = vadd.xlane.f32.xlu1 %v588_v10 }
 0x58e   :  { %646 = vrot.lane.b32.xlu1 %v4234_v63, %s4067_s7 }
 0x58f   :  { %597 = vrot.lane.b32.xlu0 %v4251_v13, %s4066_s6 }
 0x592   :  { %644 = vrot.lane.b32.xlu1 %v4242_v5, %s4067_s7 }
 0x602   :  { %v587_v11 = vpop.xlane.xlu0 %586 }
 0x603   :  { %3974 = vrcp.f32 %v587_v11 }
 0x606   :  { %v590_v12 = vpop.xlane.xlu1 %589  ;;  %v598_v14 = vpop.permute.xlu0 %597 }
 0x607   :  { %3976 = vrcp.f32 %v590_v12  ;;  %3545 = vmatpush3.bf16.msra.mxu1 %v598_v14 }
 0x608   :  { %3550 = vmatprep.subr.bf16.mxu1 %v4064_v2 }
 0x60a   :  { %v647_v21 = vpop.permute.xlu1 %646 }
 0x60b   :  { %v652_v23 = vsel %vm395_vm1, %v647_v21, 0 }
 0x60e   :  { %v645_v24 = vpop.permute.xlu1 %644 }
 0x610   :  { %v3975_v16 = vpop.eup %3974 }
 0x611   :  { %v593_v18 = vmul.f32 %v3975_v16, %v3971_v7 }
 0x614   :  { %v3977_v17 = vpop.eup %3976 }
 0x615   :  { %v594_v19 = vmul.f32 %v3977_v17, %v3973_v9 }
 0x617   :  { %v595_v22 = vpack.c.bf16 %v594_v19, %v593_v18 }
 0x619   :  { %3547 = vmatmul.mubr.msk.bf16.vlgmr.msra.gmra.mxu1 %vm447_vm2, %v595_v22 }
 0x61a   :  { %3551 = vmatpush3.bf16.xpose.msra.mxu1 %v652_v23  ;;  %3552 = vmatprep.mubr.msk.bf16.mxu1 %vm4065_vm0, %v4064_v2 }
 0x61b   :  { %3556 = vmatprep.subr.bf16.mxu1 %v4064_v2 }
 0x621   :  { %3553 = vmatmul.mubr.msk.bf16.vlgmr.msra.gmra.mxu1 %vm395_vm1, %v645_v24 }
 0x622   :  { %3558 = vmatprep.mubr.msk.bf16.mxu1 %vm4065_vm0, %v4064_v2 }
 0x6d9   :  { %v4308_v25 = vpop.f32.mrf.mxu1 }
 0x6db   :  { %v3548_v26 = vpop.f32.mrf.mxu1 }
 0x6dd   :  { %v4310_v27 = vpop.f32.mrf.mxu1 }
 0x6de   :  { %v3768_v28 = vpack.i.bf16 %v4310_v27, %v4308_v25  ;;  %v3822_v25 = vld [vmem:[%s4969_s3 + $0xf8] sm:$0xff]   ;;  %v3824_v27 = vld [vmem:[%s4969_s3 + $0xe8] sm:$0xff]  }
 0x6df   :  { %v3549_v29 = vpop.f32.mrf.mxu1  ;;  %3575 = vmatpush3.bf16.msra.mxu0 %v3822_v25 }
 0x6e0   :  { %3576 = vmatprep.subr.bf16.mxu0 %v4064_v2 }
 0x6e1   :  { %v688_v30 = vpop.f32.mrf.mxu1 }
 0x6e2   :  { %v695_v31 = vmul.f32 0.17677669, %v688_v30 }
 0x6e3   :  { %v3554_v32 = vpop.f32.mrf.mxu1 }
 0x6e4   :  { %v697_v33 = vadd.f32 %v695_v31, %v4258_v15 }
 0x6e5   :  { %v691_v34 = vpop.f32.mrf.mxu1 }
 0x6e6   :  { %v696_v35 = vmul.f32 0.17677669, %v691_v34  ;;  %v699_v36 = vsel %vm447_vm2, %v697_v33, -inf }
 0x6e7   :  { %700 = vmax.xlane.f32.xlu1 %v699_v36  ;;  %v3555_v37 = vpop.f32.mrf.mxu1 }
 0x6e8   :  { %v698_v38 = vadd.f32 %v696_v35, %v4264_v20 }
 0x6ea   :  { %v702_v39 = vsel %vm447_vm2, %v698_v38, -inf }
 0x6eb   :  { %703 = vmax.xlane.f32.xlu0 %v702_v39  ;;  %v3826_v39 = vld [vmem:[%s4969_s3 + $0xd8] sm:$0xff]  }
 0x6f8   :  { %722 = vrot.lane.b32.xlu1 %v4251_v13, %s4067_s7 }
 0x6fc   :  { %769 = vrot.lane.b32.xlu1 %v4242_v5, %s4068_s8 }
 0x770   :  { %v701_v40 = vpop.xlane.xlu1 %700 }
 0x771   :  { %v705_v43 = vsub.f32 %v697_v33, %v701_v40  ;;  %v3827_v40 = vld [vmem:[%s4969_s3 + $0xd0] sm:$0xff]  }
 0x773   :  { %v707_v44 = vmul.f32 1.442695, %v705_v43  ;;  %v3828_v43 = vld [vmem:[%s4969_s3 + $0xc8] sm:$0xff]  }
 0x774   :  { %v723_v45 = vpop.permute.xlu1 %722  ;;  %v704_v46 = vpop.xlane.xlu0 %703 }
 0x775   :  { %3978 = vpow2.f32 %v707_v44  ;;  %v706_v47 = vsub.f32 %v698_v38, %v704_v46  ;;  %3557 = vmatpush3.bf16.msra.mxu1 %v723_v45  ;;  %v3829_v44 = vld [vmem:[%s4969_s3 + $0xc0] sm:$0xff]  }
 0x776   :  { %3562 = vmatprep.subr.bf16.mxu1 %v4064_v2 }
 0x777   :  { %v709_v49 = vmul.f32 1.442695, %v706_v47 }
 0x779   :  { %3980 = vpow2.f32 %v709_v49 }
 0x782   :  { %v3979_v51 = vpop.eup %3978 }
 0x783   :  { %v711_v52 = vsel %vm447_vm2, %v3979_v51, 0.0 }
 0x784   :  { %712 = vadd.xlane.f32.xlu0 %v711_v52 }
 0x786   :  { %v3981_v53 = vpop.eup %3980 }
 0x787   :  { %v714_v54 = vsel %vm447_vm2, %v3981_v53, 0.0 }
 0x788   :  { %715 = vadd.xlane.f32.xlu0 %v714_v54 }
 0x79e   :  { %771 = vrot.lane.b32.xlu0 %v4234_v63, %s4068_s8  ;;  %v770_v63 = vpop.permute.xlu1 %769 }
 0x80d   :  { %v713_v5 = vpop.xlane.xlu0 %712 }
 0x80e   :  { %3982 = vrcp.f32 %v713_v5 }
 0x811   :  { %v716_v55 = vpop.xlane.xlu0 %715 }
 0x812   :  { %3984 = vrcp.f32 %v716_v55 }
 0x815   :  { %v772_v60 = vpop.permute.xlu0 %771 }
 0x816   :  { %v777_v62 = vsel %vm395_vm1, %v772_v60, 0 }
 0x81b   :  { %v3983_v56 = vpop.eup %3982 }
 0x81c   :  { %v719_v58 = vmul.f32 %v3983_v56, %v3979_v51 }
 0x81f   :  { %v3985_v57 = vpop.eup %3984 }
 0x820   :  { %v720_v59 = vmul.f32 %v3985_v57, %v3981_v53 }
 0x822   :  { %v721_v61 = vpack.c.bf16 %v720_v59, %v719_v58 }
 0x824   :  { %3559 = vmatmul.mubr.msk.bf16.vlgmr.msra.gmra.mxu1 %vm447_vm2, %v721_v61 }
 0x825   :  { %3563 = vmatpush3.bf16.xpose.msra.mxu1 %v777_v62  ;;  %3564 = vmatprep.mubr.msk.bf16.mxu1 %vm4065_vm0, %v4064_v2 }
 0x826   :  { %3568 = vmatprep.subr.bf16.mxu1 %v4064_v2 }
 0x82c   :  { %3565 = vmatmul.mubr.msk.bf16.vlgmr.msra.gmra.mxu1 %vm395_vm1, %v770_v63 }
 0x82d   :  { %3570 = vmatprep.mubr.msk.bf16.mxu1 %vm4065_vm0, %v4064_v2 }
 0x8e4   :  { %v762_v0 = vpop.f32.mrf.mxu1 }
 0x8e6   :  { %v3560_v1 = vpop.f32.mrf.mxu1 }
 0x8e8   :  { %v765_v3 = vpop.f32.mrf.mxu1 }
 0x8e9   :  { %v3773_v4 = vpack.i.bf16 %v765_v3, %v762_v0 }
 0x8ea   :  { %v3561_v6 = vpop.f32.mrf.mxu1 }
 0x8ec   :  { %v813_v7 = vpop.f32.mrf.mxu1 }
 0x8ed   :  { %v820_v8 = vmul.f32 0.17677669, %v813_v7 }
 0x8ee   :  { %v3566_v9 = vpop.f32.mrf.mxu1 }
 0x8ef   :  { %v822_v10 = vadd.f32 %v820_v8, %v4258_v15 }
 0x8f0   :  { %v816_v11 = vpop.f32.mrf.mxu1 }
 0x8f1   :  { %v821_v12 = vmul.f32 0.17677669, %v816_v11  ;;  %v824_v14 = vsel %vm447_vm2, %v822_v10, -inf }
 0x8f2   :  { %825 = vmax.xlane.f32.xlu1 %v824_v14  ;;  %v3567_v16 = vpop.f32.mrf.mxu1  ;;  %v3832_v14 = vld [vmem:[%s4972_s4 + $0x74] ss:$8 sps:$4 sm:$0xff]  }
 0x8f3   :  { %v823_v17 = vadd.f32 %v821_v12, %v4264_v20  ;;  %v3830_v12 = vld [vmem:[%s4972_s4 + $0x70] ss:$8 sps:$4 sm:$0xff]  }
 0x8f5   :  { %v827_v18 = vsel %vm447_vm2, %v823_v17, -inf }
 0x8f6   :  { %828 = vmax.xlane.f32.xlu0 %v827_v18 }
 0x97b   :  { %v826_v19 = vpop.xlane.xlu1 %825 }
 0x97c   :  { %v830_v21 = vsub.f32 %v822_v10, %v826_v19 }
 0x97e   :  { %v832_v22 = vmul.f32 1.442695, %v830_v21 }
 0x97f   :  { %v829_v23 = vpop.xlane.xlu0 %828 }
 0x980   :  { %3986 = vpow2.f32 %v832_v22  ;;  %v831_v24 = vsub.f32 %v823_v17, %v829_v23  ;;  %v3835_v23 = vld [vmem:[%s4972_s4 + $0x64] ss:$8 sps:$4 sm:$0xff]  }
 0x982   :  { %v834_v26 = vmul.f32 1.442695, %v831_v24  ;;  %v3833_v24 = vld [vmem:[%s4972_s4 + $0x60] ss:$8 sps:$4 sm:$0xff]  }
 0x984   :  { %3988 = vpow2.f32 %v834_v26  ;;  %v3838_v26 = vld [vmem:[%s4972_s4 + $0x54] ss:$8 sps:$4 sm:$0xff]  }
 0x98d   :  { %v3987_v15 = vpop.eup %3986 }
 0x98e   :  { %v836_v29 = vsel %vm447_vm2, %v3987_v15, 0.0 }
 0x98f   :  { %837 = vadd.xlane.f32.xlu0 %v836_v29  ;;  %v3839_v29 = vld [vmem:[%s4972_s4 + $0x40] ss:$8 sps:$4 sm:$0xff]  }
 0x991   :  { %v3989_v30 = vpop.eup %3988 }
 0x992   :  { %v839_v31 = vsel %vm447_vm2, %v3989_v30, 0.0 }
 0x993   :  { %840 = vadd.xlane.f32.xlu1 %v839_v31  ;;  %v3844_v31 = vld [vmem:[%s4972_s4 + $0x34] ss:$8 sps:$4 sm:$0xff]  }
 0x9a4   :  { %3769 = vrot.lane.b32.xlu1 %v3768_v28, %s4068_s8  ;;  %v3825_v28 = vld [vmem:[%s4969_s3 + $0xe0] sm:$0xff]  }
 0x9a5   :  { %847 = vrot.lane.b32.xlu0 %v4251_v13, %s4068_s8  ;;  %v3823_v13 = vld [vmem:[%s4969_s3 + $0xf0] sm:$0xff]  }
 0x9a6   :  { %3577 = vmatpush3.bf16.msra.mxu0 %v3823_v13 }
 0x9a7   :  { %3578 = vmatprep.subr.bf16.mxu0 %v4064_v2 }
 0x9a8   :  { %3774 = vrot.lane.b32.xlu1 %v3773_v4, %s4067_s7  ;;  %v3151_v4 = vld [vmem:[%s4970_s2 + $0x5] ss:$0 sm:$0xff] }
 0x9aa   :  { %3579 = vmatpush3.bf16.msra.mxu0 %v3824_v27 }
 0x9ab   :  { %3580 = vmatprep.subr.bf16.mxu0 %v4064_v2 }
 0x9ae   :  { %3581 = vmatpush3.bf16.msra.mxu0 %v3825_v28 }
 0x9af   :  { %3582 = vmatprep.subr.bf16.mxu0 %v4064_v2 }
 0x9b2   :  { %3583 = vmatpush3.bf16.msra.mxu0 %v3826_v39 }
 0x9b3   :  { %3584 = vmatprep.subr.bf16.mxu0 %v4064_v2 }
 0x9b6   :  { %3585 = vmatpush3.bf16.msra.mxu0 %v3827_v40 }
 0x9b7   :  { %3586 = vmatprep.subr.bf16.mxu0 %v4064_v2 }
 0x9ba   :  { %3587 = vmatpush3.bf16.msra.mxu0 %v3828_v43 }
 0x9bb   :  { %3588 = vmatprep.subr.bf16.mxu0 %v4064_v2 }
 0x9be   :  { %3589 = vmatpush3.bf16.msra.mxu0 %v3829_v44 }
 0xa18   :  { %v838_v20 = vpop.xlane.xlu0 %837 }
 0xa19   :  { %3990 = vrcp.f32 %v838_v20  ;;  %v3842_v20 = vld [vmem:[%s4972_s4 + $0x30] ss:$8 sps:$4 sm:$0xff]  }
 0xa1c   :  { %v841_v32 = vpop.xlane.xlu1 %840  ;;  %v848_v33 = vpop.permute.xlu0 %847 }
 0xa1d   :  { %3992 = vrcp.f32 %v841_v32  ;;  %3569 = vmatpush3.bf16.msra.mxu1 %v848_v33  ;;  %v4069_v32 = vmov 0   ;;  %v3847_v33 = vld [vmem:[%s4972_s4 + $0x24] ss:$8 sps:$4 sm:$0xff]  }
 0xa1e   :  { %1182 = vmatprep.subr.bf16.mxu1 %v3832_v14 }
 0xa20   :  { %v3770_v52 = vpop.permute.xlu1 %3769 }
 0xa21   :  { %v3772_v54 = vunpack.i.h.bf16 %v3770_v52  ;;  %v3771_v5 = vunpack.i.l.bf16 %v3770_v52 }
 0xa23   :  { %v919_v58 = vsel %vm395_vm1, %v4285_v50, %v3772_v54  ;;  %v918_v59 = vsel %vm395_vm1, %v4283_v48, %v3771_v5 }
 0xa24   :  { %v3775_v53 = vpop.permute.xlu1 %3774 }
 0xa25   :  { %v3777_v55 = vunpack.i.h.bf16 %v3775_v53  ;;  %v3776_v56 = vunpack.i.l.bf16 %v3775_v53 }
 0xa26   :  { %v3991_v34 = vpop.eup %3990 }
 0xa27   :  { %v844_v36 = vmul.f32 %v3991_v34, %v3987_v15  ;;  %v921_v62 = vsel %vm920_vm3, %v918_v59, %v3776_v56  ;;  %v922_v63 = vsel %vm920_vm3, %v919_v58, %v3777_v55  ;;  %v3836_v15 = vld [vmem:[%s4972_s4 + $0x50] ss:$8 sps:$4 sm:$0xff]   ;;  %v3845_v34 = vld [vmem:[%s4972_s4 + $0x20] ss:$8 sps:$4 sm:$0xff]  }
 0xa28   :  { %v3854_v55 = vld [vmem:[%s4969_s3 + $0x178] sm:$0xff]   ;;  %v3857_v58 = vld [vmem:[%s4969_s3 + $0x130] sm:$0xff]   ;;  %v3858_v59 = vld [vmem:[%s4969_s3 + $0x168] sm:$0xff]  }
 0xa29   :  { %v3855_v56 = vld [vmem:[%s4969_s3 + $0x138] sm:$0xff]   ;;  %3352 = vmatprep.subr.bf16.mxu0 %v3854_v55 }
 0xa2a   :  { %v3993_v35 = vpop.eup %3992 }
 0xa2b   :  { %v845_v37 = vmul.f32 %v3993_v35, %v3989_v30  ;;  %v3841_v30 = vld [vmem:[%s4972_s4 + $0x44] ss:$8 sps:$4 sm:$0xff]   ;;  %v3850_v35 = vld [vmem:[%s4972_s4 + $0x14] ss:$8 sps:$4 sm:$0xff]  }
 0xa2d   :  { %v846_v38 = vpack.c.bf16 %v845_v37, %v844_v36  ;;  %v3848_v36 = vld [vmem:[%s4972_s4 + $0x10] ss:$8 sps:$4 sm:$0xff]   ;;  %v3853_v37 = vld [vmem:[%s4972_s4 + $0x4] ss:$8 sps:$4 sm:$0xff]  }
 0xa2f   :  { %3571 = vmatmul.mubr.msk.bf16.vlgmr.msra.gmra.mxu1 %vm447_vm2, %v846_v38  ;;  %v3851_v38 = vld [vmem:[%s4972_s4] ss:$8 sps:$4 sm:$0xff]  }
 0xa30   :  { %1183 = vmatpush1.bf16.msra.mxu1 %v3830_v12  ;;  %1214 = vmatprep.mubr.bf16.mxu1 %v4069_v32 }
 0xa31   :  { %1184 = vmatprep.subr.bf16.mxu1 %v3835_v23 }
 0xa34   :  { %1185 = vmatpush1.bf16.msra.mxu1 %v3833_v24 }
 0xa35   :  { %1186 = vmatprep.subr.bf16.mxu1 %v3838_v26 }
 0xa38   :  { %1187 = vmatpush1.bf16.msra.mxu1 %v3836_v15 }
 0xa39   :  { %1188 = vmatprep.subr.bf16.mxu1 %v3841_v30 }
 0xa3c   :  { %1189 = vmatpush1.bf16.msra.mxu1 %v3839_v29 }
 0xa3d   :  { %1190 = vmatprep.subr.bf16.mxu1 %v3844_v31 }
 0xa40   :  { %1191 = vmatpush1.bf16.msra.mxu1 %v3842_v20 }
 0xa41   :  { %1192 = vmatprep.subr.bf16.mxu1 %v3847_v33 }
 0xa44   :  { %1193 = vmatpush1.bf16.msra.mxu1 %v3845_v34 }
 0xa45   :  { %1194 = vmatprep.subr.bf16.mxu1 %v3850_v35 }
 0xa48   :  { %1195 = vmatpush1.bf16.msra.mxu1 %v3848_v36 }
 0xa49   :  { %1196 = vmatprep.subr.bf16.mxu1 %v3853_v37 }
 0xa4c   :  { %1197 = vmatpush1.bf16.msra.mxu1 %v3851_v38 }
 0xa4d   :  { %3594 = vmatprep.subr.bf16.mxu1 %v4064_v2 }
 0xaef   :  { %v887_v45 = vpop.f32.mrf.mxu1 }
 0xaf1   :  { %v3572_v46 = vpop.f32.mrf.mxu1 }
 0xaf3   :  { %v890_v47 = vpop.f32.mrf.mxu1 }
 0xaf4   :  { %v3778_v49 = vpack.i.bf16 %v890_v47, %v887_v45  ;;  %v3160_v45 = vld [vmem:[%s4970_s2 + $0x6] ss:$0 sm:$0xff] }
 0xaf5   :  { %v3573_v51 = vpop.f32.mrf.mxu1 }
 0xaf6   :  { %3779 = vrot.lane.b32.xlu1 %v3778_v49, %s4066_s6  ;;  %v3161_v51 = vld [vmem:[%s4970_s2 + $0x7] ss:$0 sm:$0xff] }
 0xb68   :  { %v3780_v57 = vpop.permute.xlu1 %3779 }
 0xb69   :  { %v3782_v60 = vunpack.i.h.bf16 %v3780_v57  ;;  %v3781_v61 = vunpack.i.l.bf16 %v3780_v57  ;;  %v3856_v57 = vld [vmem:[%s4969_s3 + $0x170] sm:$0xff]  }
 0xb6b   :  { %v925_v0 = vsel %vm923_vm4, %v922_v63, %v3782_v60  ;;  %v924_v1 = vsel %vm923_vm4, %v921_v62, %v3781_v61  ;;  %v3859_v60 = vld [vmem:[%s4969_s3 + $0x128] sm:$0xff]   ;;  %v3860_v61 = vld [vmem:[%s4969_s3 + $0x160] sm:$0xff]   ;;  %v3862_v63 = vld [vmem:[%s4969_s3 + $0x158] sm:$0xff]  }
 0xb6c   :  { %v942_v3 = vpack.c.bf16 %v925_v0, %v924_v1  ;;  %v3861_v62 = vld [vmem:[%s4969_s3 + $0x120] sm:$0xff]   ;;  %v3863_v0 = vld [vmem:[%s4969_s3 + $0x118] sm:$0xff]   ;;  %v3864_v1 = vld [vmem:[%s4969_s3 + $0x150] sm:$0xff]  }
 0xb6e   :  { %3591 = vmatmul.mubr.bf16.vlgmr.msra.gmra.mxu0 %v942_v3  ;;  %v3865_v3 = vld [vmem:[%s4969_s3 + $0x110] sm:$0xff]  }
 0xb6f   :  { %3353 = vmatpush3.bf16.msra.mxu0 %v3855_v56 }
 0xb70   :  { %3354 = vmatprep.subr.bf16.mxu0 %v3856_v57 }
 0xb73   :  { %3355 = vmatpush3.bf16.msra.mxu0 %v3857_v58 }
 0xb74   :  { %3356 = vmatprep.subr.bf16.mxu0 %v3858_v59 }
 0xb77   :  { %3357 = vmatpush3.bf16.msra.mxu0 %v3859_v60  ;;  %v3180_v60 = vld [vmem:[%s4970_s2 + $0xa] ss:$0 sm:$0xff] }
 0xb78   :  { %3358 = vmatprep.subr.bf16.mxu0 %v3860_v61 }
 0xb7b   :  { %3359 = vmatpush3.bf16.msra.mxu0 %v3861_v62 }
 0xb7c   :  { %3360 = vmatprep.subr.bf16.mxu0 %v3862_v63 }
 0xb7f   :  { %3361 = vmatpush3.bf16.msra.mxu0 %v3863_v0 }
 0xb80   :  { %3362 = vmatprep.subr.bf16.mxu0 %v3864_v1 }
 0xb83   :  { %3363 = vmatpush3.bf16.msra.mxu0 %v3865_v3 }
 0xc2e   :  { %v1030_v50 = vpop.f32.mrf.mxu0 }
 0xc2f   :  { %v1031_v6 = vadd.f32 %v3151_v4, %v1030_v50  ;;  %v3867_v50 = vld [vmem:[%s4969_s3 + $0x108] sm:$0xff]  }
 0xc30   :  { %v3592_v7 = vpop.f32.mrf.mxu0 }
 0xc31   :  { %v1037_v48 = vadd.f32 %v1031_v6, %v4187_v41  ;;  %v3868_v6 = vld [vmem:[%s4969_s3 + $0x140] sm:$0xff]  }
 0xc32   :  { %v1033_v8 = vpop.f32.mrf.mxu0  ;;  %v3869_v7 = vld [vmem:[%s4969_s3 + $0x100] sm:$0xff]  }
 0xc33   :  { %v1034_v9 = vadd.f32 %v3151_v4, %v1033_v8  ;;  %1041 = vadd.xlane.f32.xlu0 %v1037_v48  ;;  %v3866_v4 = vld [vmem:[%s4969_s3 + $0x148] sm:$0xff]  }
 0xc34   :  { %v3593_v10 = vpop.f32.mrf.mxu0  ;;  %3364 = vmatprep.subr.bf16.mxu0 %v3866_v4 }
 0xc35   :  { %v1038_v11 = vadd.f32 %v1034_v9, %v4189_v42  ;;  %3365 = vmatpush3.bf16.msra.mxu0 %v3867_v50  ;;  %v3163_v9 = vld [vmem:[%s4970_s2 + $0x9] ss:$0 sm:$0xff] }
 0xc36   :  { %3366 = vmatprep.subr.bf16.mxu0 %v3868_v6 }
 0xc37   :  { %1043 = vadd.xlane.f32.xlu1 %v1038_v11 }
 0xc39   :  { %3367 = vmatpush3.bf16.msra.mxu0 %v3869_v7  ;;  %v3870_v7 = vld [vmem:[%s4969_s3 + $0x1b8] sm:$0xff]  }
 0xc3a   :  { %3614 = vmatprep.subr.bf16.mxu0 %v4064_v2 }
 0xcbc   :  { %v1042_v16 = vpop.xlane.xlu0 %1041 }
 0xcbd   :  { %v1045_v17 = vmul.f32 0.0078125, %v1042_v16 }
 0xcbf   :  { %v1047_v41 = vsub.f32 %v1037_v48, %v1045_v17  ;;  %v3162_v48 = vld [vmem:[%s4970_s2 + $0x8] ss:$0 sm:$0xff] }
 0xcc0   :  { %v1044_v18 = vpop.xlane.xlu1 %1043 }
 0xcc1   :  { %v1046_v19 = vmul.f32 0.0078125, %v1044_v18  ;;  %v1049_v21 = vmul.f32 %v1047_v41, %v1047_v41 }
 0xcc3   :  { %v1048_v22 = vsub.f32 %v1038_v11, %v1046_v19  ;;  %1051 = vadd.xlane.f32.xlu0 %v1049_v21 }
 0xcc5   :  { %v1050_v42 = vmul.f32 %v1048_v22, %v1048_v22 }
 0xcc7   :  { %1053 = vadd.xlane.f32.xlu0 %v1050_v42 }
 0xd4c   :  { %v1052_v25 = vpop.xlane.xlu0 %1051 }
 0xd4d   :  { %v1055_v13 = vmul.f32 0.0078125, %v1052_v25 }
 0xd4f   :  { %v1057_v27 = vadd.f32 1e-12, %v1055_v13 }
 0xd50   :  { %v1054_v28 = vpop.xlane.xlu0 %1053 }
 0xd51   :  { %3994 = vrsqrt.f32 %v1057_v27  ;;  %v1056_v39 = vmul.f32 0.0078125, %v1054_v28 }
 0xd53   :  { %v1058_v40 = vadd.f32 1e-12, %v1056_v39 }
 0xd55   :  { %3996 = vrsqrt.f32 %v1058_v40 }
 0xd5e   :  { %v3995_v43 = vpop.eup %3994 }
 0xd5f   :  { %v1061_v44 = vmul.f32 %v3995_v43, %v1047_v41 }
 0xd61   :  { %v1067_v49 = vmul.f32 %v3160_v45, %v1061_v44 }
 0xd62   :  { %v3997_v46 = vpop.eup %3996 }
 0xd63   :  { %v1062_v47 = vmul.f32 %v3997_v46, %v1048_v22  ;;  %v4450_v53 = vadd.f32 %v3161_v51, %v1067_v49 }
 0xd65   :  { %v1068_v52 = vmul.f32 %v3160_v45, %v1062_v47 }
 0xd67   :  { %v4452_v54 = vadd.f32 %v3161_v51, %v1068_v52 }
 0xd69   :  { %v1093_v5 = vpack.c.bf16 %v4452_v54, %v4450_v53 }
 0xd6b   :  { %1215 = vmatmul.mubr.bf16.vlgmr.msra.gmra.mxu1 %v1093_v5 }
 0xd6c   :  { %3610 = vmatprep.mubr.msk.bf16.mxu1 %vm4065_vm0, %v4064_v2  ;;  %3595 = vmatpush3.bf16.msra.mxu1 %v3870_v7 }
 0xd6d   :  { %3596 = vmatprep.subr.bf16.mxu1 %v4064_v2 }
 0xe2b   :  { %v1216_v8 = vpop.f32.mrf.mxu1 }
 0xe2c   :  { %v1217_v10 = vadd.f32 %v3162_v48, %v1216_v8 }
 0xe2d   :  { %v1218_v11 = vpop.f32.mrf.mxu1 }
 0xe2e   :  { %v1229_v12 = vmul.f32 0.044715, %v1217_v10  ;;  %v1219_v14 = vadd.f32 %v3163_v9, %v1218_v11  ;;  %v1225_v51 = vmul.f32 0.5, %v1217_v10 }
 0xe2f   :  { %v1220_v16 = vpop.f32.mrf.mxu1 }
 0xe30   :  { %v1233_v17 = vmul.f32 %v1229_v12, %v1217_v10  ;;  %v1230_v41 = vmul.f32 0.044715, %v1219_v14  ;;  %v1221_v18 = vadd.f32 %v3162_v48, %v1220_v16  ;;  %v1226_v46 = vmul.f32 0.5, %v1219_v14  ;;  %v3871_v48 = vld [vmem:[%s4969_s3 + $0x1f8] sm:$0xff]   ;;  %v3872_v16 = vld [vmem:[%s4969_s3 + $0x1b0] sm:$0xff]  }
 0xe31   :  { %v1222_v19 = vpop.f32.mrf.mxu1  ;;  %3597 = vmatpush3.bf16.msra.mxu1 %v3872_v16 }
 0xe32   :  { %v1237_v21 = vmul.f32 %v1233_v17, %v1217_v10  ;;  %v1234_v22 = vmul.f32 %v1230_v41, %v1219_v14  ;;  %v1231_v42 = vmul.f32 0.044715, %v1221_v18  ;;  %v1223_v23 = vadd.f32 %v3163_v9, %v1222_v19  ;;  %v3873_v17 = vld [vmem:[%s4969_s3 + $0x1f0] sm:$0xff]   ;;  %3598 = vmatprep.subr.bf16.mxu1 %v4064_v2  ;;  %v3874_v41 = vld [vmem:[%s4969_s3 + $0x1a8] sm:$0xff]   ;;  %v3876_v19 = vld [vmem:[%s4969_s3 + $0x1a0] sm:$0xff]  }
 0xe33   :  { %v1227_v44 = vmul.f32 0.5, %v1221_v18 }
 0xe34   :  { %v1241_v24 = vadd.f32 %v1237_v21, %v1217_v10  ;;  %v1238_v26 = vmul.f32 %v1234_v22, %v1219_v14  ;;  %v1235_v15 = vmul.f32 %v1231_v42, %v1221_v18  ;;  %v1232_v29 = vmul.f32 0.044715, %v1223_v23  ;;  %v3877_v21 = vld [vmem:[%s4969_s3 + $0x1e0] sm:$0xff]   ;;  %v3878_v22 = vld [vmem:[%s4969_s3 + $0x198] sm:$0xff]  }
 0xe35   :  { %v1228_v47 = vmul.f32 0.5, %v1223_v23  ;;  %3599 = vmatpush3.bf16.msra.mxu1 %v3874_v41  ;;  %v3879_v42 = vld [vmem:[%s4969_s3 + $0x1d8] sm:$0xff]  }
 0xe36   :  { %v1239_v30 = vmul.f32 %v1235_v15, %v1221_v18  ;;  %v1236_v31 = vmul.f32 %v1232_v29, %v1223_v23  ;;  %v1242_v20 = vadd.f32 %v1238_v26, %v1219_v14  ;;  %v1245_v33 = vmul.f32 0.7978846, %v1241_v24  ;;  %3600 = vmatprep.subr.bf16.mxu1 %v4064_v2  ;;  %v3881_v24 = vld [vmem:[%s4969_s3 + $0x1d0] sm:$0xff]   ;;  %v3882_v26 = vld [vmem:[%s4969_s3 + $0x188] sm:$0xff]   ;;  %v3884_v29 = vld [vmem:[%s4969_s3 + $0x180] sm:$0xff]  }
 0xe37   :  { %v3883_v15 = vld [vmem:[%s4969_s3 + $0x1c8] sm:$0xff]  }
 0xe38   :  { %v1243_v34 = vadd.f32 %v1239_v30, %v1221_v18  ;;  %v1240_v35 = vmul.f32 %v1236_v31, %v1223_v23  ;;  %v1246_v36 = vmul.f32 0.7978846, %v1242_v20  ;;  %v3875_v18 = vld [vmem:[%s4969_s3 + $0x1e8] sm:$0xff]   ;;  %v3885_v30 = vld [vmem:[%s4969_s3 + $0x1c0] sm:$0xff]  }
 0xe39   :  { %3601 = vmatpush3.bf16.msra.mxu1 %v3876_v19 }
 0xe3a   :  { %v1247_v37 = vmul.f32 0.7978846, %v1243_v34  ;;  %v1244_v38 = vadd.f32 %v1240_v35, %v1223_v23  ;;  %3998 = vtanh.f32 %v1246_v36  ;;  %3602 = vmatprep.subr.bf16.mxu1 %v4064_v2  ;;  %v3880_v23 = vld [vmem:[%s4969_s3 + $0x190] sm:$0xff]  }
 0xe3b   :  { %4000 = vtanh.f32 %v1245_v33 }
 0xe3c   :  { %4002 = vtanh.f32 %v1247_v37  ;;  %v1248_v25 = vmul.f32 0.7978846, %v1244_v38 }
 0xe3d   :  { %3603 = vmatpush3.bf16.msra.mxu1 %v3878_v22 }
 0xe3e   :  { %4004 = vtanh.f32 %v1248_v25  ;;  %3604 = vmatprep.subr.bf16.mxu1 %v4064_v2  ;;  %v3197_v25 = vld [vmem:[%s4970_s2 + $0xb] ss:$0 sm:$0xff] }
 0xe41   :  { %3605 = vmatpush3.bf16.msra.mxu1 %v3880_v23 }
 0xe42   :  { %3606 = vmatprep.subr.bf16.mxu1 %v4064_v2 }
 0xe45   :  { %3607 = vmatpush3.bf16.msra.mxu1 %v3882_v26 }
 0xe46   :  { %3608 = vmatprep.subr.bf16.mxu1 %v4064_v2 }
 0xe47   :  { %v3999_v13 = vpop.eup %3998 }
 0xe48   :  { %v4001_v27 = vpop.eup %4000  ;;  %v1254_v39 = vadd.f32 1.0, %v3999_v13 }
 0xe49   :  { %v4003_v28 = vpop.eup %4002  ;;  %v1253_v45 = vadd.f32 1.0, %v4001_v27  ;;  %3609 = vmatpush3.bf16.msra.mxu1 %v3884_v29 }
 0xe4a   :  { %v1255_v40 = vadd.f32 1.0, %v4003_v28  ;;  %v1258_v5 = vmul.f32 %v1254_v39, %v1226_v46  ;;  %3634 = vmatprep.subr.bf16.mxu1 %v4064_v2  ;;  %v3198_v39 = vld [vmem:[%s4970_s2 + $0xc] ss:$0 sm:$0xff] }
 0xe4b   :  { %v4005_v43 = vpop.eup %4004  ;;  %v1257_v56 = vmul.f32 %v1253_v45, %v1225_v51  ;;  %v3886_v45 = vld [vmem:[%s4969_s3 + $0x238] sm:$0xff]   ;;  %v3889_v51 = vld [vmem:[%s4969_s3 + $0x220] sm:$0xff]  }
 0xe4c   :  { %v1256_v49 = vadd.f32 1.0, %v4005_v43  ;;  %v1259_v52 = vmul.f32 %v1255_v40, %v1227_v44 }
 0xe4e   :  { %v1260_v55 = vmul.f32 %v1256_v49, %v1228_v47  ;;  %v1293_v58 = vpack.c.bf16 %v1259_v52, %v1257_v56  ;;  %v3887_v47 = vld [vmem:[%s4969_s3 + $0x230] sm:$0xff]   ;;  %v3888_v49 = vld [vmem:[%s4969_s3 + $0x228] sm:$0xff]   ;;  %v3890_v52 = vld [vmem:[%s4969_s3 + $0x218] sm:$0xff]  }
 0xe4f   :  { %v3893_v56 = vld [vmem:[%s4969_s3 + $0x200] sm:$0xff]  }
 0xe50   :  { %v1294_v57 = vpack.c.bf16 %v1260_v55, %v1258_v5  ;;  %v3891_v5 = vld [vmem:[%s4969_s3 + $0x210] sm:$0xff]   ;;  %v3892_v55 = vld [vmem:[%s4969_s3 + $0x208] sm:$0xff]  }
 0xe52   :  { %1428 = vmatprep.mubr.bf16.mxu0 %v1294_v57 }
 0xe53   :  { %1429 = vmatmul.mubr.bf16.vlgmr.msra.gmra.mxu0 %v1293_v58 }
 0xe54   :  { %3630 = vmatprep.mubr.msk.bf16.mxu0 %vm4065_vm0, %v4064_v2  ;;  %3615 = vmatpush3.bf16.msra.mxu0 %v3871_v48 }
 0xe55   :  { %3616 = vmatprep.subr.bf16.mxu0 %v4064_v2 }
 0xe58   :  { %3617 = vmatpush3.bf16.msra.mxu0 %v3873_v17 }
 0xe59   :  { %3618 = vmatprep.subr.bf16.mxu0 %v4064_v2 }
 0xe5c   :  { %3619 = vmatpush3.bf16.msra.mxu0 %v3875_v18 }
 0xe5d   :  { %3620 = vmatprep.subr.bf16.mxu0 %v4064_v2 }
 0xe60   :  { %3621 = vmatpush3.bf16.msra.mxu0 %v3877_v21 }
 0xe61   :  { %3622 = vmatprep.subr.bf16.mxu0 %v4064_v2 }
 0xe64   :  { %3623 = vmatpush3.bf16.msra.mxu0 %v3879_v42 }
 0xe65   :  { %3624 = vmatprep.subr.bf16.mxu0 %v4064_v2 }
 0xe68   :  { %3625 = vmatpush3.bf16.msra.mxu0 %v3881_v24 }
 0xe69   :  { %3626 = vmatprep.subr.bf16.mxu0 %v4064_v2 }
 0xe6c   :  { %3627 = vmatpush3.bf16.msra.mxu0 %v3883_v15 }
 0xe6d   :  { %3628 = vmatprep.subr.bf16.mxu0 %v4064_v2 }
 0xe70   :  { %3629 = vmatpush3.bf16.msra.mxu0 %v3885_v30 }
 0xe71   :  { %3654 = vmatprep.subr.bf16.mxu0 %v4064_v2 }
 0xf13   :  { %v3368_v59 = vpop.f32.mrf.mxu0 }
 0xf15   :  { %v3369_v61 = vpop.f32.mrf.mxu0 }
 0xf16   :  { %v3370_v62 = vadd.f32 %v3369_v61, %v3368_v59  ;;  %v3199_v59 = vld [vmem:[%s4970_s2 + $0xd] ss:$0 sm:$0xff] }
 0xf17   :  { %v3371_v63 = vpop.f32.mrf.mxu0 }
 0xf18   :  { %v1431_v0 = vadd.f32 %v3370_v62, %v3180_v60 }
 0xf19   :  { %v3372_v1 = vpop.f32.mrf.mxu0 }
 0xf1a   :  { %v3373_v3 = vadd.f32 %v3372_v1, %v3371_v63  ;;  %v1437_v4 = vadd.f32 %v1431_v0, %v4450_v53 }
 0xf1c   :  { %v1434_v50 = vadd.f32 %v3373_v3, %v3180_v60  ;;  %1441 = vadd.xlane.f32.xlu0 %v1437_v4  ;;  %v3208_v60 = vld [vmem:[%s4970_s2 + $0xe] ss:$0 sm:$0xff] }
 0xf1e   :  { %v1438_v6 = vadd.f32 %v1434_v50, %v4452_v54 }
 0xf20   :  { %1443 = vadd.xlane.f32.xlu1 %v1438_v6 }
 0xfa5   :  { %v1442_v53 = vpop.xlane.xlu0 %1441 }
 0xfa6   :  { %v1445_v8 = vmul.f32 0.0078125, %v1442_v53 }
 0xfa8   :  { %v1447_v9 = vsub.f32 %v1437_v4, %v1445_v8 }
 0xfa9   :  { %v1444_v10 = vpop.xlane.xlu1 %1443 }
 0xfaa   :  { %v1446_v54 = vmul.f32 0.0078125, %v1444_v10  ;;  %v1449_v11 = vmul.f32 %v1447_v9, %v1447_v9  ;;  %v3217_v10 = vld [vmem:[%s4970_s2 + $0xf] ss:$0 sm:$0xff] }
 0xfac   :  { %v1448_v12 = vsub.f32 %v1438_v6, %v1446_v54  ;;  %1451 = vadd.xlane.f32.xlu0 %v1449_v11 }
 0xfae   :  { %v1450_v14 = vmul.f32 %v1448_v12, %v1448_v12 }
 0xfb0   :  { %1453 = vadd.xlane.f32.xlu1 %v1450_v14 }
0x1035   :  { %v1452_v31 = vpop.xlane.xlu0 %1451 }
0x1036   :  { %v1455_v20 = vmul.f32 0.0078125, %v1452_v31  ;;  %v4062_v31 = vld [vmem:[%s4971_s1] sm:$0xff] }
0x1038   :  { %v1457_v33 = vadd.f32 1e-12, %v1455_v20 }
0x1039   :  { %v1454_v34 = vpop.xlane.xlu1 %1453 }
0x103a   :  { %4006 = vrsqrt.f32 %v1457_v33  ;;  %v1456_v35 = vmul.f32 0.0078125, %v1454_v34 }
0x103c   :  { %v1458_v36 = vadd.f32 1e-12, %v1456_v35 }
0x103e   :  { %4008 = vrsqrt.f32 %v1458_v36 }
0x1047   :  { %v4007_v37 = vpop.eup %4006 }
0x1048   :  { %v1461_v38 = vmul.f32 %v4007_v37, %v1447_v9  ;;  %v4063_v37 = vld [vmem:[%s4971_s1 + $0x8] sm:$0xff] }
0x104a   :  { %v1467_v28 = vmul.f32 %v3197_v25, %v1461_v38 }
0x104b   :  { %v4009_v13 = vpop.eup %4008 }
0x104c   :  { %v1462_v27 = vmul.f32 %v4009_v13, %v1448_v12  ;;  %v4590_v43 = vadd.f32 %v3198_v39, %v1467_v28 }
0x104e   :  { %v1468_v40 = vmul.f32 %v3197_v25, %v1462_v27 }
0x1050   :  { %v4592_v44 = vadd.f32 %v3198_v39, %v1468_v40 }
0x1052   :  { %v1491_v46 = vpack.c.bf16 %v4592_v44, %v4590_v43 }
0x1054   :  { %3611 = vmatmul.mubr.bf16.vlgmr.msra.gmra.mxu1 %v1491_v46  ;;  %3631 = vmatmul.mubr.bf16.vlgmr.msra.gmra.mxu0 %v1491_v46 }
0x1055   :  { %3635 = vmatpush3.bf16.msra.mxu1 %v3886_v45  ;;  %3650 = vmatprep.mubr.msk.bf16.mxu1 %vm4065_vm0, %v4064_v2 }
0x1056   :  { %3636 = vmatprep.subr.bf16.mxu1 %v4064_v2  ;;  %3656 = vmatprep.mubr.msk.bf16.mxu0 %vm4065_vm0, %v4064_v2 }
0x1059   :  { %3637 = vmatpush3.bf16.msra.mxu1 %v3887_v47 }
0x105a   :  { %3638 = vmatprep.subr.bf16.mxu1 %v4064_v2 }
0x105d   :  { %3639 = vmatpush3.bf16.msra.mxu1 %v3888_v49 }
0x105e   :  { %3640 = vmatprep.subr.bf16.mxu1 %v4064_v2 }
0x1061   :  { %3641 = vmatpush3.bf16.msra.mxu1 %v3889_v51 }
0x1062   :  { %3642 = vmatprep.subr.bf16.mxu1 %v4064_v2 }
0x1065   :  { %3643 = vmatpush3.bf16.msra.mxu1 %v3890_v52 }
0x1066   :  { %3644 = vmatprep.subr.bf16.mxu1 %v4064_v2 }
0x1069   :  { %3645 = vmatpush3.bf16.msra.mxu1 %v3891_v5 }
0x106a   :  { %3646 = vmatprep.subr.bf16.mxu1 %v4064_v2 }
0x106d   :  { %3647 = vmatpush3.bf16.msra.mxu1 %v3892_v55 }
0x106e   :  { %3648 = vmatprep.subr.bf16.mxu1 %v4064_v2 }
0x1071   :  { %3649 = vmatpush3.bf16.msra.mxu1 %v3893_v56 }
0x1072   :  { %3660 = vmatprep.subr.bf16.mxu1 %v4064_v2 }
0x1074   :  { %3651 = vmatmul.mubr.bf16.vlgmr.msra.gmra.mxu1 %v1491_v46 }
0x1075   :  { %3662 = vmatprep.mubr.msk.bf16.mxu1 %vm4065_vm0, %v4064_v2 }
0x1114   :  { %v1579_v57 = vpop.f32.mrf.mxu1  ;;  %v1689_v58 = vpop.f32.mrf.mxu0 }
0x1115   :  { %v1580_v1 = vadd.f32 %v3199_v59, %v1579_v57  ;;  %v1690_v3 = vadd.f32 %v3208_v60, %v1689_v58 }
0x1116   :  { %v3612_v61 = vpop.f32.mrf.mxu1  ;;  %v3632_v62 = vpop.f32.mrf.mxu0 }
0x1118   :  { %v1582_v63 = vpop.f32.mrf.mxu1  ;;  %v1692_v0 = vpop.f32.mrf.mxu0 }
0x1119   :  { %v1583_v4 = vadd.f32 %v3199_v59, %v1582_v63  ;;  %v1693_v50 = vadd.f32 %v3208_v60, %v1692_v0 }
0x111a   :  { %v3613_v6 = vpop.f32.mrf.mxu1  ;;  %v3633_v7 = vpop.f32.mrf.mxu0 }
0x111b   :  { %v1806_v48 = vpack.c.bf16 %v1583_v4, %v1580_v1  ;;  %v1807_v53 = vpack.c.bf16 %v1693_v50, %v1690_v3 }
0x111d   :  { %1931 = vrot.lane.b32.xlu0 %v1807_v53, %s4066_s6  ;;  %1928 = vrot.lane.b32.xlu1 %v1806_v48, %s4066_s6  ;;  %v1812_v8 = vsel %vm395_vm1, %v1807_v53, 0 }
0x111e   :  { %3655 = vmatpush3.bf16.xpose.msra.mxu0 %v1812_v8 }
0x111f   :  { %3666 = vmatprep.subr.bf16.mxu0 %v4064_v2 }
0x1121   :  { %2182 = vrot.lane.b32.xlu0 %v1807_v53, %s4068_s8  ;;  %2057 = vrot.lane.b32.xlu1 %v1807_v53, %s4067_s7 }
0x1125   :  { %2055 = vrot.lane.b32.xlu1 %v1806_v48, %s4067_s7  ;;  %3657 = vmatmul.mubr.msk.bf16.vlgmr.msra.gmra.mxu0 %vm395_vm1, %v1806_v48 }
0x1126   :  { %3668 = vmatprep.mubr.msk.bf16.mxu0 %vm4065_vm0, %v4064_v2 }
0x1129   :  { %2180 = vrot.lane.b32.xlu1 %v1806_v48, %s4068_s8 }
0x1134   :  { %v1799_v9 = vpop.f32.mrf.mxu1 }
0x1135   :  { %v1800_v12 = vadd.f32 %v3217_v10, %v1799_v9 }
0x1136   :  { %v3652_v54 = vpop.f32.mrf.mxu1 }
0x1138   :  { %v1802_v11 = vpop.f32.mrf.mxu1 }
0x1139   :  { %v1803_v14 = vadd.f32 %v3217_v10, %v1802_v11 }
0x113a   :  { %v3653_v16 = vpop.f32.mrf.mxu1 }
0x113b   :  { %v4654_v17 = vpack.c.bf16 %v1803_v14, %v1800_v12 }
0x113d   :  { %3661 = vmatpush3.bf16.msra.mxu1 %v4654_v17 }
0x113e   :  { %3672 = vmatprep.subr.bf16.mxu1 %v4064_v2 }
0x118f   :  { %v1932_v41 = vpop.permute.xlu0 %1931  ;;  %v1929_v18 = vpop.permute.xlu1 %1928 }
0x1190   :  { %v1937_v19 = vsel %vm395_vm1, %v1932_v41, 0 }
0x1191   :  { %3667 = vmatpush3.bf16.xpose.msra.mxu0 %v1937_v19 }
0x1192   :  { %3678 = vmatprep.subr.bf16.mxu0 %v4064_v2 }
0x1193   :  { %v2058_v21 = vpop.permute.xlu1 %2057  ;;  %v2183_v42 = vpop.permute.xlu0 %2182 }
0x1194   :  { %v2063_v22 = vsel %vm395_vm1, %v2058_v21, 0  ;;  %v2188_v24 = vsel %vm395_vm1, %v2183_v42, 0 }
0x1197   :  { %v2056_v23 = vpop.permute.xlu1 %2055 }
0x1198   :  { %3669 = vmatmul.mubr.msk.bf16.vlgmr.msra.gmra.mxu0 %vm395_vm1, %v1929_v18 }
0x1199   :  { %3679 = vmatpush3.bf16.xpose.msra.mxu0 %v2063_v22  ;;  %3680 = vmatprep.mubr.msk.bf16.mxu0 %vm4065_vm0, %v4064_v2 }
0x119a   :  { %3690 = vmatprep.subr.bf16.mxu0 %v4064_v2 }
0x119b   :  { %v2181_v26 = vpop.permute.xlu1 %2180 }
0x11a0   :  { %3681 = vmatmul.mubr.msk.bf16.vlgmr.msra.gmra.mxu0 %vm395_vm1, %v2056_v23 }
0x11a1   :  { %3691 = vmatpush3.bf16.xpose.msra.mxu0 %v2188_v24  ;;  %3692 = vmatprep.mubr.msk.bf16.mxu0 %vm4065_vm0, %v4064_v2 }
0x11a2   :  { %3702 = vmatprep.subr.bf16.mxu0 %v4064_v2 }
0x11a8   :  { %3693 = vmatmul.mubr.msk.bf16.vlgmr.msra.gmra.mxu0 %vm395_vm1, %v2181_v26 }
0x11a9   :  { %3718 = vmatprep.mubr.msk.bf16.mxu0 %vm4065_vm0, %v4064_v2 }
0x11e5   :  { %v1848_v15 = vpop.f32.mrf.mxu0 }
0x11e6   :  { %v1855_v29 = vmul.f32 0.17677669, %v1848_v15 }
0x11e7   :  { %v3658_v30 = vpop.f32.mrf.mxu0 }
0x11e8   :  { %v1857_v20 = vadd.f32 %v4062_v31, %v1855_v29 }
0x11e9   :  { %v1851_v33 = vpop.f32.mrf.mxu0 }
0x11ea   :  { %v1856_v34 = vmul.f32 0.17677669, %v1851_v33  ;;  %v1859_v35 = vsel %vm447_vm2, %v1857_v20, -inf }
0x11eb   :  { %1860 = vmax.xlane.f32.xlu0 %v1859_v35  ;;  %v3659_v36 = vpop.f32.mrf.mxu0 }
0x11ec   :  { %v1858_v38 = vadd.f32 %v4063_v37, %v1856_v34 }
0x11ee   :  { %v1862_v25 = vsel %vm447_vm2, %v1858_v38, -inf }
0x11ef   :  { %1863 = vmax.xlane.f32.xlu1 %v1862_v25 }
0x1258   :  { %v1973_v13 = vpop.f32.mrf.mxu0 }
0x1259   :  { %v1980_v27 = vmul.f32 0.17677669, %v1973_v13 }
0x125a   :  { %v3670_v28 = vpop.f32.mrf.mxu0 }
0x125b   :  { %v1982_v39 = vadd.f32 %v4062_v31, %v1980_v27 }
0x125c   :  { %v1976_v40 = vpop.f32.mrf.mxu0 }
0x125d   :  { %v1981_v45 = vmul.f32 0.17677669, %v1976_v40  ;;  %v1984_v46 = vsel %vm447_vm2, %v1982_v39, -inf }
0x125e   :  { %1985 = vmax.xlane.f32.xlu0 %v1984_v46  ;;  %v3671_v47 = vpop.f32.mrf.mxu0 }
0x125f   :  { %v1983_v49 = vadd.f32 %v4063_v37, %v1981_v45 }
0x1260   :  { %v2099_v51 = vpop.f32.mrf.mxu0 }
0x1261   :  { %v2106_v52 = vmul.f32 0.17677669, %v2099_v51  ;;  %v1987_v5 = vsel %vm447_vm2, %v1983_v49, -inf }
0x1262   :  { %1988 = vmax.xlane.f32.xlu0 %v1987_v5  ;;  %v3682_v55 = vpop.f32.mrf.mxu0 }
0x1263   :  { %v2108_v56 = vadd.f32 %v4062_v31, %v2106_v52 }
0x1264   :  { %v2102_v57 = vpop.f32.mrf.mxu0 }
0x1265   :  { %v2107_v58 = vmul.f32 0.17677669, %v2102_v57  ;;  %v2110_v59 = vsel %vm447_vm2, %v2108_v56, -inf }
0x1266   :  { %2111 = vmax.xlane.f32.xlu0 %v2110_v59  ;;  %v3683_v60 = vpop.f32.mrf.mxu0 }
0x1267   :  { %v2109_v61 = vadd.f32 %v4063_v37, %v2107_v58 }
0x1268   :  { %v2224_v62 = vpop.f32.mrf.mxu0 }
0x1269   :  { %v2231_v63 = vmul.f32 0.17677669, %v2224_v62  ;;  %v2113_v0 = vsel %vm447_vm2, %v2109_v61, -inf }
0x126a   :  { %2114 = vmax.xlane.f32.xlu1 %v2113_v0  ;;  %v3694_v1 = vpop.f32.mrf.mxu0 }
0x126b   :  { %v2233_v3 = vadd.f32 %v4062_v31, %v2231_v63 }
0x126c   :  { %v2227_v4 = vpop.f32.mrf.mxu0 }
0x126d   :  { %v2232_v50 = vmul.f32 0.17677669, %v2227_v4  ;;  %v2235_v6 = vsel %vm447_vm2, %v2233_v3, -inf }
0x126e   :  { %2236 = vmax.xlane.f32.xlu0 %v2235_v6  ;;  %v3695_v7 = vpop.f32.mrf.mxu0 }
0x126f   :  { %v4686_v48 = vadd.f32 %v4063_v37, %v2232_v50 }
0x1271   :  { %v2238_v53 = vsel %vm447_vm2, %v4686_v48, -inf }
0x1272   :  { %2239 = vmax.xlane.f32.xlu1 %v2238_v53 }
0x1274   :  { %v1861_v8 = vpop.xlane.xlu0 %1860 }
0x1275   :  { %v1865_v9 = vsub.f32 %v1857_v20, %v1861_v8 }
0x1277   :  { %v1867_v10 = vmul.f32 1.442695, %v1865_v9 }
0x1278   :  { %v1864_v54 = vpop.xlane.xlu1 %1863 }
0x1279   :  { %4010 = vpow2.f32 %v1867_v10  ;;  %v1866_v11 = vsub.f32 %v1858_v38, %v1864_v54 }
0x127b   :  { %v1869_v12 = vmul.f32 1.442695, %v1866_v11 }
0x127d   :  { %4012 = vpow2.f32 %v1869_v12 }
0x1286   :  { %v4011_v14 = vpop.eup %4010 }
0x1287   :  { %v1871_v16 = vsel %vm447_vm2, %v4011_v14, 0.0 }
0x1288   :  { %1872 = vadd.xlane.f32.xlu0 %v1871_v16 }
0x128a   :  { %v4013_v41 = vpop.eup %4012 }
0x128b   :  { %v1874_v18 = vsel %vm447_vm2, %v4013_v41, 0.0 }
0x128c   :  { %1875 = vadd.xlane.f32.xlu1 %v1874_v18 }
0x12e7   :  { %v1986_v19 = vpop.xlane.xlu0 %1985 }
0x12e8   :  { %v1990_v21 = vsub.f32 %v1982_v39, %v1986_v19 }
0x12ea   :  { %v1992_v22 = vmul.f32 1.442695, %v1990_v21 }
0x12eb   :  { %v1989_v42 = vpop.xlane.xlu0 %1988 }
0x12ec   :  { %4014 = vpow2.f32 %v1992_v22  ;;  %v1991_v23 = vsub.f32 %v1983_v49, %v1989_v42 }
0x12ee   :  { %v1994_v24 = vmul.f32 1.442695, %v1991_v23 }
0x12ef   :  { %v2112_v26 = vpop.xlane.xlu0 %2111 }
0x12f0   :  { %4016 = vpow2.f32 %v1994_v24  ;;  %v2116_v15 = vsub.f32 %v2108_v56, %v2112_v26 }
0x12f2   :  { %v2118_v29 = vmul.f32 1.442695, %v2116_v15 }
0x12f3   :  { %v2115_v30 = vpop.xlane.xlu1 %2114 }
0x12f4   :  { %4018 = vpow2.f32 %v2118_v29  ;;  %v2117_v31 = vsub.f32 %v2109_v61, %v2115_v30  ;;  %v3894_v29 = vld [vmem:[%s4969_s3 + $0x278] sm:$0xff]  }
0x12f5   :  { %3703 = vmatpush3.bf16.msra.mxu0 %v3894_v29  ;;  %v3919_v29 = vld [vmem:[%s4972_s4 + $0xa4] ss:$8 sps:$4 sm:$0xff]  }
0x12f6   :  { %v2120_v20 = vmul.f32 1.442695, %v2117_v31  ;;  %3704 = vmatprep.subr.bf16.mxu0 %v4064_v2 }
0x12f7   :  { %v2237_v33 = vpop.xlane.xlu0 %2236 }
0x12f8   :  { %4020 = vpow2.f32 %v2120_v20  ;;  %v2241_v34 = vsub.f32 %v2233_v3, %v2237_v33  ;;  %v3895_v20 = vld [vmem:[%s4969_s3 + $0x270] sm:$0xff]  }
0x12f9   :  { %v4015_v35 = vpop.eup %4014  ;;  %3705 = vmatpush3.bf16.msra.mxu0 %v3895_v20  ;;  %v3920_v20 = vld [vmem:[%s4972_s4 + $0x90] ss:$8 sps:$4 sm:$0xff]  }
0x12fa   :  { %v2243_v36 = vmul.f32 1.442695, %v2241_v34  ;;  %v1996_v37 = vsel %vm447_vm2, %v4015_v35, 0.0  ;;  %v3896_v34 = vld [vmem:[%s4969_s3 + $0x268] sm:$0xff]   ;;  %3706 = vmatprep.subr.bf16.mxu0 %v4064_v2 }
0x12fb   :  { %1997 = vadd.xlane.f32.xlu0 %v1996_v37  ;;  %v2240_v46 = vpop.xlane.xlu1 %2239 }
0x12fc   :  { %4022 = vpow2.f32 %v2243_v36  ;;  %v2242_v5 = vsub.f32 %v4686_v48, %v2240_v46 }
0x12fd   :  { %v4017_v38 = vpop.eup %4016  ;;  %3707 = vmatpush3.bf16.msra.mxu0 %v3896_v34 }
0x12fe   :  { %v1999_v25 = vsel %vm447_vm2, %v4017_v38, 0.0  ;;  %v2245_v58 = vmul.f32 1.442695, %v2242_v5  ;;  %3708 = vmatprep.subr.bf16.mxu0 %v4064_v2 }
0x12ff   :  { %2000 = vadd.xlane.f32.xlu1 %v1999_v25  ;;  %v3898_v25 = vld [vmem:[%s4969_s3 + $0x258] sm:$0xff]  }
0x1301   :  { %v4019_v13 = vpop.eup %4018 }
0x1302   :  { %v2122_v27 = vsel %vm447_vm2, %v4019_v13, 0.0 }
0x1303   :  { %2123 = vadd.xlane.f32.xlu0 %v2122_v27  ;;  %v3900_v27 = vld [vmem:[%s4969_s3 + $0x248] sm:$0xff]  }
0x1305   :  { %v4021_v28 = vpop.eup %4020 }
0x1306   :  { %v2125_v39 = vsel %vm447_vm2, %v4021_v28, 0.0 }
0x1307   :  { %2126 = vadd.xlane.f32.xlu1 %v2125_v39 }
0x1309   :  { %v4023_v40 = vpop.eup %4022 }
0x130a   :  { %v2247_v45 = vsel %vm447_vm2, %v4023_v40, 0.0 }
0x130b   :  { %2248 = vadd.xlane.f32.xlu0 %v2247_v45 }
0x1311   :  { %v1873_v47 = vpop.xlane.xlu0 %1872 }
0x1312   :  { %4024 = vrcp.f32 %v1873_v47 }
0x1315   :  { %v1876_v49 = vpop.xlane.xlu1 %1875 }
0x1316   :  { %4026 = vrcp.f32 %v1876_v49 }
0x1317   :  { %4028 = vpow2.f32 %v2245_v58 }
0x1318   :  { %2133 = vrot.lane.b32.xlu1 %v4654_v17, %s4067_s7 }
0x131f   :  { %v4025_v51 = vpop.eup %4024 }
0x1320   :  { %v1879_v55 = vmul.f32 %v4025_v51, %v4011_v14 }
0x1321   :  { %2008 = vrot.lane.b32.xlu0 %v4654_v17, %s4066_s6 }
0x1323   :  { %v4027_v52 = vpop.eup %4026 }
0x1324   :  { %v1880_v56 = vmul.f32 %v4027_v52, %v4013_v41  ;;  %v4029_v59 = vpop.eup %4028 }
0x1325   :  { %v2250_v60 = vsel %vm447_vm2, %v4029_v59, 0.0 }
0x1326   :  { %v1881_v57 = vpack.c.bf16 %v1880_v56, %v1879_v55 }
0x1328   :  { %3663 = vmatmul.mubr.msk.bf16.vlgmr.msra.gmra.mxu1 %vm447_vm2, %v1881_v57 }
0x1329   :  { %3674 = vmatprep.mubr.msk.bf16.mxu1 %vm4065_vm0, %v4064_v2 }
0x133c   :  { %2251 = vadd.xlane.f32.xlu1 %v2250_v60 }
0x134d   :  { %2258 = vrot.lane.b32.xlu1 %v4654_v17, %s4068_s8 }
0x1384   :  { %v1998_v61 = vpop.xlane.xlu0 %1997 }
0x1385   :  { %4030 = vrcp.f32 %v1998_v61 }
0x1388   :  { %v2001_v62 = vpop.xlane.xlu1 %2000 }
0x1389   :  { %4032 = vrcp.f32 %v2001_v62 }
0x138c   :  { %v2124_v63 = vpop.xlane.xlu0 %2123 }
0x138d   :  { %4034 = vrcp.f32 %v2124_v63 }
0x1390   :  { %v2127_v0 = vpop.xlane.xlu1 %2126 }
0x1391   :  { %4036 = vrcp.f32 %v2127_v0 }
0x1392   :  { %v4031_v1 = vpop.eup %4030 }
0x1393   :  { %v2004_v50 = vmul.f32 %v4031_v1, %v4015_v35 }
0x1394   :  { %v2249_v3 = vpop.xlane.xlu0 %2248  ;;  %v2134_v17 = vpop.permute.xlu1 %2133 }
0x1395   :  { %4038 = vrcp.f32 %v2249_v3 }
0x1396   :  { %v4033_v4 = vpop.eup %4032 }
0x1397   :  { %v2005_v6 = vmul.f32 %v4033_v4, %v4017_v38  ;;  %v3897_v38 = vld [vmem:[%s4969_s3 + $0x260] sm:$0xff]   ;;  %v3234_v4 = vld [vmem:[%s4970_s2 + $0x10] ss:$0 sm:$0xff] }
0x1398   :  { %v2009_v7 = vpop.permute.xlu0 %2008  ;;  %3709 = vmatpush3.bf16.msra.mxu0 %v3897_v38 }
0x1399   :  { %3673 = vmatpush3.bf16.msra.mxu1 %v2009_v7  ;;  %v2006_v48 = vpack.c.bf16 %v2005_v6, %v2004_v50  ;;  %3710 = vmatprep.subr.bf16.mxu0 %v4064_v2 }
0x139a   :  { %3684 = vmatprep.subr.bf16.mxu1 %v4064_v2  ;;  %v4035_v53 = vpop.eup %4034 }
0x139b   :  { %v2130_v9 = vmul.f32 %v4035_v53, %v4019_v13  ;;  %v3899_v13 = vld [vmem:[%s4969_s3 + $0x250] sm:$0xff]  }
0x139c   :  { %3675 = vmatmul.mubr.msk.bf16.vlgmr.msra.gmra.mxu1 %vm447_vm2, %v2006_v48  ;;  %3711 = vmatpush3.bf16.msra.mxu0 %v3898_v25 }
0x139d   :  { %3685 = vmatpush3.bf16.msra.mxu1 %v2134_v17  ;;  %3686 = vmatprep.mubr.msk.bf16.mxu1 %vm4065_vm0, %v4064_v2 }
0x139e   :  { %v4037_v8 = vpop.eup %4036  ;;  %3696 = vmatprep.subr.bf16.mxu1 %v4064_v2  ;;  %3712 = vmatprep.subr.bf16.mxu0 %v4064_v2 }
0x139f   :  { %v2131_v10 = vmul.f32 %v4037_v8, %v4021_v28  ;;  %v3901_v28 = vld [vmem:[%s4969_s3 + $0x240] sm:$0xff]  }
0x13a0   :  { %3713 = vmatpush3.bf16.msra.mxu0 %v3899_v13 }
0x13a1   :  { %v2132_v54 = vpack.c.bf16 %v2131_v10, %v2130_v9  ;;  %3714 = vmatprep.subr.bf16.mxu0 %v4064_v2  ;;  %v3902_v10 = vld [vmem:[%s4972_s4 + $0xf0] ss:$8 sps:$4 sm:$0xff]  }
0x13a2   :  { %v4039_v14 = vpop.eup %4038 }
0x13a3   :  { %v2255_v41 = vmul.f32 %v4039_v14, %v4023_v40 }
0x13a4   :  { %3687 = vmatmul.mubr.msk.bf16.vlgmr.msra.gmra.mxu1 %vm447_vm2, %v2132_v54  ;;  %3715 = vmatpush3.bf16.msra.mxu0 %v3900_v27  ;;  %v3904_v54 = vld [vmem:[%s4972_s4 + $0xf4] ss:$8 sps:$4 sm:$0xff]  }
0x13a5   :  { %3698 = vmatprep.mubr.msk.bf16.mxu1 %vm4065_vm0, %v4064_v2  ;;  %3716 = vmatprep.subr.bf16.mxu0 %v4064_v2 }
0x13a8   :  { %3717 = vmatpush3.bf16.msra.mxu0 %v3901_v28  ;;  %v3243_v28 = vld [vmem:[%s4970_s2 + $0x11] ss:$0 sm:$0xff] }
0x13c5   :  { %v2252_v11 = vpop.xlane.xlu1 %2251 }
0x13c6   :  { %4040 = vrcp.f32 %v2252_v11 }
0x13c9   :  { %v2259_v12 = vpop.permute.xlu1 %2258 }
0x13ca   :  { %3697 = vmatpush3.bf16.msra.mxu1 %v2259_v12 }
0x13cb   :  { %2591 = vmatprep.subr.bf16.mxu1 %v3904_v54 }
0x13d3   :  { %v4041_v16 = vpop.eup %4040 }
0x13d4   :  { %v2256_v18 = vmul.f32 %v4041_v16, %v4029_v59 }
0x13d6   :  { %v2257_v19 = vpack.c.bf16 %v2256_v18, %v2255_v41 }
0x13d8   :  { %3699 = vmatmul.mubr.msk.bf16.vlgmr.msra.gmra.mxu1 %vm447_vm2, %v2257_v19  ;;  %v3907_v19 = vld [vmem:[%s4972_s4 + $0xe4] ss:$8 sps:$4 sm:$0xff]  }
0x13d9   :  { %2623 = vmatprep.mubr.bf16.mxu1 %v4069_v32  ;;  %2592 = vmatpush1.bf16.msra.mxu1 %v3902_v10 }
0x13da   :  { %2593 = vmatprep.subr.bf16.mxu1 %v3907_v19 }
0x13e8   :  { %v1920_v21 = vpop.f32.mrf.mxu1 }
0x13ea   :  { %v3664_v22 = vpop.f32.mrf.mxu1 }
0x13eb   :  { %v3910_v22 = vld [vmem:[%s4972_s4 + $0xd4] ss:$8 sps:$4 sm:$0xff]  }
0x13ec   :  { %v1923_v42 = vpop.f32.mrf.mxu1 }
0x13ee   :  { %v3665_v23 = vpop.f32.mrf.mxu1 }
0x13ef   :  { %v3911_v23 = vld [vmem:[%s4972_s4 + $0xc0] ss:$8 sps:$4 sm:$0xff]  }
0x145c   :  { %v2048_v24 = vpop.f32.mrf.mxu1 }
0x145e   :  { %v3676_v26 = vpop.f32.mrf.mxu1 }
0x145f   :  { %v3916_v26 = vld [vmem:[%s4972_s4 + $0xb4] ss:$8 sps:$4 sm:$0xff]  }
0x1460   :  { %v2051_v15 = vpop.f32.mrf.mxu1 }
0x1461   :  { %v3783_v30 = vpack.i.bf16 %v2051_v15, %v2048_v24  ;;  %v3913_v24 = vld [vmem:[%s4972_s4 + $0xc4] ss:$8 sps:$4 sm:$0xff]   ;;  %v3914_v15 = vld [vmem:[%s4972_s4 + $0xb0] ss:$8 sps:$4 sm:$0xff]  }
0x1462   :  { %v3677_v31 = vpop.f32.mrf.mxu1 }
0x1463   :  { %3784 = vrot.lane.b32.xlu1 %v3783_v30, %s4068_s8  ;;  %v3917_v30 = vld [vmem:[%s4972_s4 + $0xa0] ss:$8 sps:$4 sm:$0xff]   ;;  %v3922_v31 = vld [vmem:[%s4972_s4 + $0x94] ss:$8 sps:$4 sm:$0xff]  }
0x1464   :  { %v2173_v32 = vpop.f32.mrf.mxu1 }
0x1466   :  { %v3688_v33 = vpop.f32.mrf.mxu1 }
0x1467   :  { %v3923_v33 = vld [vmem:[%s4972_s4 + $0x80] ss:$8 sps:$4 sm:$0xff]  }
0x1468   :  { %v2176_v35 = vpop.f32.mrf.mxu1 }
0x1469   :  { %v3788_v36 = vpack.i.bf16 %v2176_v35, %v2173_v32  ;;  %v3925_v32 = vld [vmem:[%s4972_s4 + $0x84] ss:$8 sps:$4 sm:$0xff]  }
0x146a   :  { %v3689_v37 = vpop.f32.mrf.mxu1 }
0x146b   :  { %3789 = vrot.lane.b32.xlu0 %v3788_v36, %s4067_s7 }
0x1498   :  { %v2298_v39 = vpop.f32.mrf.mxu1 }
0x149a   :  { %v3700_v40 = vpop.f32.mrf.mxu1 }
0x149c   :  { %v2301_v45 = vpop.f32.mrf.mxu1 }
0x149d   :  { %v3793_v46 = vpack.i.bf16 %v2301_v45, %v2298_v39 }
0x149e   :  { %v3701_v47 = vpop.f32.mrf.mxu1 }
0x149f   :  { %3794 = vrot.lane.b32.xlu1 %v3793_v46, %s4066_s6  ;;  %v3244_v46 = vld [vmem:[%s4970_s2 + $0x12] ss:$0 sm:$0xff] }
0x14d5   :  { %v3785_v49 = vpop.permute.xlu1 %3784 }
0x14d6   :  { %v3787_v52 = vunpack.i.h.bf16 %v3785_v49  ;;  %v3786_v5 = vunpack.i.l.bf16 %v3785_v49 }
0x14d8   :  { %v2330_v58 = vsel %vm395_vm1, %v1923_v42, %v3787_v52  ;;  %v2329_v59 = vsel %vm395_vm1, %v1920_v21, %v3786_v5  ;;  %v3905_v21 = vld [vmem:[%s4972_s4 + $0xe0] ss:$8 sps:$4 sm:$0xff]   ;;  %v3908_v42 = vld [vmem:[%s4972_s4 + $0xd0] ss:$8 sps:$4 sm:$0xff]  }
0x14d9   :  { %2594 = vmatpush1.bf16.msra.mxu1 %v3905_v21  ;;  %v3926_v5 = vld [vmem:[%s4969_s3 + $0x2f8] sm:$0xff]  }
0x14da   :  { %2595 = vmatprep.subr.bf16.mxu1 %v3910_v22  ;;  %3426 = vmatprep.subr.bf16.mxu0 %v3926_v5 }
0x14dd   :  { %v3790_v51 = vpop.permute.xlu0 %3789  ;;  %2596 = vmatpush1.bf16.msra.mxu1 %v3908_v42 }
0x14de   :  { %v3792_v55 = vunpack.i.h.bf16 %v3790_v51  ;;  %v3791_v56 = vunpack.i.l.bf16 %v3790_v51  ;;  %2597 = vmatprep.subr.bf16.mxu1 %v3913_v24 }
0x14e0   :  { %v2332_v62 = vsel %vm920_vm3, %v2330_v58, %v3792_v55  ;;  %v2331_v63 = vsel %vm920_vm3, %v2329_v59, %v3791_v56  ;;  %v3927_v55 = vld [vmem:[%s4969_s3 + $0x2b8] sm:$0xff]   ;;  %v3928_v56 = vld [vmem:[%s4969_s3 + $0x2f0] sm:$0xff]   ;;  %v3930_v58 = vld [vmem:[%s4969_s3 + $0x2e8] sm:$0xff]  }
0x14e1   :  { %2598 = vmatpush1.bf16.msra.mxu1 %v3911_v23  ;;  %v3931_v59 = vld [vmem:[%s4969_s3 + $0x2a8] sm:$0xff]  }
0x14e2   :  { %2599 = vmatprep.subr.bf16.mxu1 %v3916_v26 }
0x14e5   :  { %2600 = vmatpush1.bf16.msra.mxu1 %v3914_v15 }
0x14e6   :  { %2601 = vmatprep.subr.bf16.mxu1 %v3919_v29 }
0x14e9   :  { %2602 = vmatpush1.bf16.msra.mxu1 %v3917_v30 }
0x14ea   :  { %2603 = vmatprep.subr.bf16.mxu1 %v3922_v31 }
0x14ed   :  { %2604 = vmatpush1.bf16.msra.mxu1 %v3920_v20 }
0x14ee   :  { %2605 = vmatprep.subr.bf16.mxu1 %v3925_v32 }
0x14f1   :  { %2606 = vmatpush1.bf16.msra.mxu1 %v3923_v33 }
0x14f2   :  { %3722 = vmatprep.subr.bf16.mxu1 %v4064_v2 }
0x1511   :  { %v3795_v57 = vpop.permute.xlu1 %3794 }
0x1512   :  { %v3797_v60 = vunpack.i.h.bf16 %v3795_v57  ;;  %v3796_v61 = vunpack.i.l.bf16 %v3795_v57  ;;  %v3929_v57 = vld [vmem:[%s4969_s3 + $0x2b0] sm:$0xff]  }
0x1514   :  { %v2334_v0 = vsel %vm923_vm4, %v2332_v62, %v3797_v60  ;;  %v2333_v1 = vsel %vm923_vm4, %v2331_v63, %v3796_v61  ;;  %v3932_v60 = vld [vmem:[%s4969_s3 + $0x2e0] sm:$0xff]   ;;  %v3934_v62 = vld [vmem:[%s4969_s3 + $0x2d8] sm:$0xff]  }
0x1515   :  { %v2351_v3 = vpack.c.bf16 %v2334_v0, %v2333_v1  ;;  %v3933_v61 = vld [vmem:[%s4969_s3 + $0x2a0] sm:$0xff]   ;;  %v3935_v63 = vld [vmem:[%s4969_s3 + $0x298] sm:$0xff]   ;;  %v3936_v0 = vld [vmem:[%s4969_s3 + $0x2d0] sm:$0xff]  }
0x1516   :  { %v3937_v1 = vld [vmem:[%s4969_s3 + $0x290] sm:$0xff]  }
0x1517   :  { %3719 = vmatmul.mubr.bf16.vlgmr.msra.gmra.mxu0 %v2351_v3  ;;  %v3938_v3 = vld [vmem:[%s4969_s3 + $0x2c8] sm:$0xff]  }
0x1518   :  { %3427 = vmatpush3.bf16.msra.mxu0 %v3927_v55 }
0x1519   :  { %3428 = vmatprep.subr.bf16.mxu0 %v3928_v56 }
0x151c   :  { %3429 = vmatpush3.bf16.msra.mxu0 %v3929_v57 }
0x151d   :  { %3430 = vmatprep.subr.bf16.mxu0 %v3930_v58  ;;  %v3263_v58 = vld [vmem:[%s4970_s2 + $0x15] ss:$0 sm:$0xff] }
0x1520   :  { %3431 = vmatpush3.bf16.msra.mxu0 %v3931_v59 }
0x1521   :  { %3432 = vmatprep.subr.bf16.mxu0 %v3932_v60 }
0x1524   :  { %3433 = vmatpush3.bf16.msra.mxu0 %v3933_v61 }
0x1525   :  { %3434 = vmatprep.subr.bf16.mxu0 %v3934_v62 }
0x1528   :  { %3435 = vmatpush3.bf16.msra.mxu0 %v3935_v63 }
0x1529   :  { %3436 = vmatprep.subr.bf16.mxu0 %v3936_v0 }
0x152c   :  { %3437 = vmatpush3.bf16.msra.mxu0 %v3937_v1 }
0x152d   :  { %3438 = vmatprep.subr.bf16.mxu0 %v3938_v3 }
0x15d7   :  { %v2439_v50 = vpop.f32.mrf.mxu0 }
0x15d8   :  { %v2440_v6 = vadd.f32 %v3234_v4, %v2439_v50  ;;  %v3940_v50 = vld [vmem:[%s4969_s3 + $0x2c0] sm:$0xff]  }
0x15d9   :  { %v3720_v7 = vpop.f32.mrf.mxu0 }
0x15da   :  { %v2446_v48 = vadd.f32 %v2440_v6, %v4590_v43  ;;  %v3941_v6 = vld [vmem:[%s4969_s3 + $0x280] sm:$0xff]   ;;  %v3245_v7 = vld [vmem:[%s4970_s2 + $0x13] ss:$0 sm:$0xff] }
0x15db   :  { %v2442_v53 = vpop.f32.mrf.mxu0 }
0x15dc   :  { %v2443_v17 = vadd.f32 %v3234_v4, %v2442_v53  ;;  %2450 = vadd.xlane.f32.xlu0 %v2446_v48  ;;  %v3939_v4 = vld [vmem:[%s4969_s3 + $0x288] sm:$0xff]   ;;  %v3246_v53 = vld [vmem:[%s4970_s2 + $0x14] ss:$0 sm:$0xff] }
0x15dd   :  { %v3721_v8 = vpop.f32.mrf.mxu0  ;;  %3439 = vmatpush3.bf16.msra.mxu0 %v3939_v4 }
0x15de   :  { %v2447_v9 = vadd.f32 %v2443_v17, %v4592_v44  ;;  %3440 = vmatprep.subr.bf16.mxu0 %v3940_v50  ;;  %v3942_v50 = vld [vmem:[%s4969_s3 + $0x338] sm:$0xff]  }
0x15e0   :  { %2452 = vadd.xlane.f32.xlu1 %v2447_v9 }
0x15e1   :  { %3441 = vmatpush3.bf16.msra.mxu0 %v3941_v6 }
0x15e2   :  { %3742 = vmatprep.subr.bf16.mxu0 %v4064_v2 }
0x1665   :  { %v2451_v11 = vpop.xlane.xlu0 %2450 }
0x1666   :  { %v2454_v12 = vmul.f32 0.0078125, %v2451_v11 }
0x1668   :  { %v2456_v43 = vsub.f32 %v2446_v48, %v2454_v12 }
0x1669   :  { %v2453_v14 = vpop.xlane.xlu1 %2452 }
0x166a   :  { %v2455_v16 = vmul.f32 0.0078125, %v2453_v14  ;;  %v2458_v41 = vmul.f32 %v2456_v43, %v2456_v43 }
0x166c   :  { %v2457_v18 = vsub.f32 %v2447_v9, %v2455_v16  ;;  %2460 = vadd.xlane.f32.xlu0 %v2458_v41 }
0x166e   :  { %v2459_v44 = vmul.f32 %v2457_v18, %v2457_v18 }
0x1670   :  { %2462 = vadd.xlane.f32.xlu0 %v2459_v44 }
0x16f5   :  { %v2461_v34 = vpop.xlane.xlu0 %2460 }
0x16f6   :  { %v2464_v35 = vmul.f32 0.0078125, %v2461_v34 }
0x16f8   :  { %v2466_v36 = vadd.f32 1e-12, %v2464_v35 }
0x16f9   :  { %v2463_v37 = vpop.xlane.xlu0 %2462 }
0x16fa   :  { %4042 = vrsqrt.f32 %v2466_v36  ;;  %v2465_v38 = vmul.f32 0.0078125, %v2463_v37 }
0x16fc   :  { %v2467_v25 = vadd.f32 1e-12, %v2465_v38 }
0x16fe   :  { %4044 = vrsqrt.f32 %v2467_v25 }
0x1707   :  { %v4043_v13 = vpop.eup %4042 }
0x1708   :  { %v2470_v27 = vmul.f32 %v4043_v13, %v2456_v43 }
0x170a   :  { %v2476_v45 = vmul.f32 %v3243_v28, %v2470_v27 }
0x170b   :  { %v4045_v39 = vpop.eup %4044 }
0x170c   :  { %v2471_v40 = vmul.f32 %v4045_v39, %v2457_v18  ;;  %v4818_v49 = vadd.f32 %v3244_v46, %v2476_v45 }
0x170e   :  { %v2477_v47 = vmul.f32 %v3243_v28, %v2471_v40 }
0x1710   :  { %v4820_v51 = vadd.f32 %v3244_v46, %v2477_v47 }
0x1712   :  { %v2502_v52 = vpack.c.bf16 %v4820_v51, %v4818_v49 }
0x1714   :  { %2624 = vmatmul.mubr.bf16.vlgmr.msra.gmra.mxu1 %v2502_v52 }
0x1715   :  { %3738 = vmatprep.mubr.msk.bf16.mxu1 %vm4065_vm0, %v4064_v2  ;;  %3723 = vmatpush3.bf16.msra.mxu1 %v3942_v50 }
0x1716   :  { %3724 = vmatprep.subr.bf16.mxu1 %v4064_v2 }
0x17d4   :  { %v2625_v48 = vpop.f32.mrf.mxu1 }
0x17d5   :  { %v2626_v17 = vadd.f32 %v3245_v7, %v2625_v48 }
0x17d6   :  { %v2627_v8 = vpop.f32.mrf.mxu1 }
0x17d7   :  { %v2638_v9 = vmul.f32 0.044715, %v2626_v17  ;;  %v2628_v10 = vadd.f32 %v3246_v53, %v2627_v8  ;;  %v2634_v45 = vmul.f32 0.5, %v2626_v17 }
0x17d8   :  { %v2629_v54 = vpop.f32.mrf.mxu1 }
0x17d9   :  { %v2642_v11 = vmul.f32 %v2638_v9, %v2626_v17  ;;  %v2639_v12 = vmul.f32 0.044715, %v2628_v10  ;;  %v2630_v43 = vadd.f32 %v3245_v7, %v2629_v54  ;;  %v2635_v28 = vmul.f32 0.5, %v2628_v10  ;;  %v3945_v54 = vld [vmem:[%s4969_s3 + $0x320] sm:$0xff]  }
0x17da   :  { %v2631_v14 = vpop.f32.mrf.mxu1 }
0x17db   :  { %v2646_v16 = vmul.f32 %v2642_v11, %v2626_v17  ;;  %v2643_v41 = vmul.f32 %v2639_v12, %v2628_v10  ;;  %v2640_v18 = vmul.f32 0.044715, %v2630_v43  ;;  %v2632_v44 = vadd.f32 %v3246_v53, %v2631_v14  ;;  %v3946_v11 = vld [vmem:[%s4969_s3 + $0x318] sm:$0xff]   ;;  %v3947_v12 = vld [vmem:[%s4969_s3 + $0x310] sm:$0xff]   ;;  %v3949_v14 = vld [vmem:[%s4969_s3 + $0x300] sm:$0xff]  }
0x17dc   :  { %v2636_v13 = vmul.f32 0.5, %v2630_v43 }
0x17dd   :  { %v2650_v19 = vadd.f32 %v2646_v16, %v2626_v17  ;;  %v2647_v21 = vmul.f32 %v2643_v41, %v2628_v10  ;;  %v2644_v22 = vmul.f32 %v2640_v18, %v2630_v43  ;;  %v2641_v42 = vmul.f32 0.044715, %v2632_v44  ;;  %v3950_v16 = vld [vmem:[%s4969_s3 + $0x378] sm:$0xff]   ;;  %v3951_v41 = vld [vmem:[%s4969_s3 + $0x370] sm:$0xff]  }
0x17de   :  { %v2637_v39 = vmul.f32 0.5, %v2632_v44 }
0x17df   :  { %v2648_v23 = vmul.f32 %v2644_v22, %v2630_v43  ;;  %v2645_v24 = vmul.f32 %v2641_v42, %v2632_v44  ;;  %v2651_v26 = vadd.f32 %v2647_v21, %v2628_v10  ;;  %v2654_v15 = vmul.f32 0.7978846, %v2650_v19  ;;  %v3944_v10 = vld [vmem:[%s4969_s3 + $0x328] sm:$0xff]  }
0x17e1   :  { %v2652_v29 = vadd.f32 %v2648_v23, %v2630_v43  ;;  %v2649_v30 = vmul.f32 %v2645_v24, %v2632_v44  ;;  %v2655_v31 = vmul.f32 0.7978846, %v2651_v26  ;;  %v3948_v43 = vld [vmem:[%s4969_s3 + $0x308] sm:$0xff]   ;;  %v3280_v26 = vld [vmem:[%s4970_s2 + $0x16] ss:$0 sm:$0xff] }
0x17e3   :  { %v2656_v20 = vmul.f32 0.7978846, %v2652_v29  ;;  %v2653_v32 = vadd.f32 %v2649_v30, %v2632_v44  ;;  %4046 = vtanh.f32 %v2655_v31  ;;  %v3281_v31 = vld [vmem:[%s4970_s2 + $0x17] ss:$0 sm:$0xff] }
0x17e4   :  { %4048 = vtanh.f32 %v2654_v15 }
0x17e5   :  { %4050 = vtanh.f32 %v2656_v20  ;;  %v2657_v33 = vmul.f32 0.7978846, %v2653_v32 }
0x17e7   :  { %4052 = vtanh.f32 %v2657_v33 }
0x17f0   :  { %v4047_v34 = vpop.eup %4046 }
0x17f1   :  { %v4049_v35 = vpop.eup %4048  ;;  %v2663_v37 = vadd.f32 1.0, %v4047_v34 }
0x17f2   :  { %v4051_v36 = vpop.eup %4050  ;;  %v2662_v27 = vadd.f32 1.0, %v4049_v35  ;;  %v3952_v35 = vld [vmem:[%s4969_s3 + $0x368] sm:$0xff]  }
0x17f3   :  { %v2664_v38 = vadd.f32 1.0, %v4051_v36  ;;  %v2667_v47 = vmul.f32 %v2663_v37, %v2635_v28  ;;  %v3953_v36 = vld [vmem:[%s4969_s3 + $0x360] sm:$0xff]   ;;  %v3954_v37 = vld [vmem:[%s4969_s3 + $0x358] sm:$0xff]  }
0x17f4   :  { %v4053_v25 = vpop.eup %4052  ;;  %v2666_v5 = vmul.f32 %v2662_v27, %v2634_v45  ;;  %v3282_v27 = vld [vmem:[%s4970_s2 + $0x18] ss:$0 sm:$0xff] }
0x17f5   :  { %v2665_v40 = vadd.f32 1.0, %v4053_v25  ;;  %v2668_v46 = vmul.f32 %v2664_v38, %v2636_v13  ;;  %v3955_v38 = vld [vmem:[%s4969_s3 + $0x350] sm:$0xff]   ;;  %v3956_v25 = vld [vmem:[%s4969_s3 + $0x348] sm:$0xff]   ;;  %v3957_v13 = vld [vmem:[%s4969_s3 + $0x340] sm:$0xff]  }
0x17f7   :  { %v2669_v52 = vmul.f32 %v2665_v40, %v2637_v39  ;;  %v2702_v56 = vpack.c.bf16 %v2668_v46, %v2666_v5 }
0x17f9   :  { %v2703_v55 = vpack.c.bf16 %v2669_v52, %v2667_v47 }
0x17fb   :  { %2837 = vmatprep.mubr.bf16.mxu0 %v2703_v55 }
0x17fc   :  { %2838 = vmatmul.mubr.bf16.vlgmr.msra.gmra.mxu0 %v2702_v56 }
0x17fd   :  { %3758 = vmatprep.mubr.msk.bf16.mxu0 %vm4065_vm0, %v4064_v2  ;;  %3743 = vmatpush3.bf16.msra.mxu0 %v3950_v16 }
0x17fe   :  { %3744 = vmatprep.subr.bf16.mxu0 %v4064_v2 }
0x1801   :  { %3745 = vmatpush3.bf16.msra.mxu0 %v3951_v41 }
0x1802   :  { %3746 = vmatprep.subr.bf16.mxu0 %v4064_v2 }
0x1805   :  { %3747 = vmatpush3.bf16.msra.mxu0 %v3952_v35 }
0x1806   :  { %3748 = vmatprep.subr.bf16.mxu0 %v4064_v2 }
0x1809   :  { %3749 = vmatpush3.bf16.msra.mxu0 %v3953_v36 }
0x180a   :  { %3750 = vmatprep.subr.bf16.mxu0 %v4064_v2 }
0x180d   :  { %3751 = vmatpush3.bf16.msra.mxu0 %v3954_v37 }
0x180e   :  { %3752 = vmatprep.subr.bf16.mxu0 %v4064_v2 }
0x1811   :  { %3753 = vmatpush3.bf16.msra.mxu0 %v3955_v38 }
0x1812   :  { %3754 = vmatprep.subr.bf16.mxu0 %v4064_v2 }
0x1815   :  { %3755 = vmatpush3.bf16.msra.mxu0 %v3956_v25 }
0x1816   :  { %3756 = vmatprep.subr.bf16.mxu0 %v4064_v2 }
0x1819   :  { %3757 = vmatpush3.bf16.msra.mxu0 %v3957_v13 }
0x18bc   :  { %v3442_v57 = vpop.f32.mrf.mxu0 }
0x18be   :  { %v3443_v59 = vpop.f32.mrf.mxu0 }
0x18bf   :  { %v3444_v60 = vadd.f32 %v3443_v59, %v3442_v57 }
0x18c0   :  { %v3445_v61 = vpop.f32.mrf.mxu0 }
0x18c1   :  { %v2840_v62 = vadd.f32 %v3444_v60, %v3263_v58 }
0x18c2   :  { %v3446_v63 = vpop.f32.mrf.mxu0 }
0x18c3   :  { %v3447_v0 = vadd.f32 %v3446_v63, %v3445_v61  ;;  %v2846_v1 = vadd.f32 %v2840_v62, %v4818_v49 }
0x18c5   :  { %v2843_v3 = vadd.f32 %v3447_v0, %v3263_v58  ;;  %2850 = vadd.xlane.f32.xlu0 %v2846_v1 }
0x18c7   :  { %v2847_v4 = vadd.f32 %v2843_v3, %v4820_v51  ;;  %v3943_v51 = vld [vmem:[%s4969_s3 + $0x330] sm:$0xff]  }
0x18c8   :  { %3725 = vmatpush3.bf16.msra.mxu1 %v3943_v51 }
0x18c9   :  { %2852 = vadd.xlane.f32.xlu1 %v2847_v4  ;;  %3726 = vmatprep.subr.bf16.mxu1 %v4064_v2 }
0x18cc   :  { %3727 = vmatpush3.bf16.msra.mxu1 %v3944_v10 }
0x18cd   :  { %3728 = vmatprep.subr.bf16.mxu1 %v4064_v2 }
0x18d0   :  { %3729 = vmatpush3.bf16.msra.mxu1 %v3945_v54 }
0x18d1   :  { %3730 = vmatprep.subr.bf16.mxu1 %v4064_v2 }
0x18d4   :  { %3731 = vmatpush3.bf16.msra.mxu1 %v3946_v11 }
0x18d5   :  { %3732 = vmatprep.subr.bf16.mxu1 %v4064_v2 }
0x18d8   :  { %3733 = vmatpush3.bf16.msra.mxu1 %v3947_v12 }
0x18d9   :  { %3734 = vmatprep.subr.bf16.mxu1 %v4064_v2 }
0x18dc   :  { %3735 = vmatpush3.bf16.msra.mxu1 %v3948_v43 }
0x18dd   :  { %3736 = vmatprep.subr.bf16.mxu1 %v4064_v2  ;;  %v3291_v2 = vld [vmem:[%s4970_s2 + $0x19] ss:$0 sm:$0xff] }
0x18e0   :  { %3737 = vmatpush3.bf16.msra.mxu1 %v3949_v14 }
0x194e   :  { %v2851_v6 = vpop.xlane.xlu0 %2850 }
0x194f   :  { %v2854_v7 = vmul.f32 0.0078125, %v2851_v6 }
0x1951   :  { %v2856_v48 = vsub.f32 %v2846_v1, %v2854_v7 }
0x1952   :  { %v2853_v53 = vpop.xlane.xlu1 %2852 }
0x1953   :  { %v2855_v17 = vmul.f32 0.0078125, %v2853_v53  ;;  %v2858_v8 = vmul.f32 %v2856_v48, %v2856_v48 }
0x1955   :  { %v2857_v9 = vsub.f32 %v2847_v4, %v2855_v17  ;;  %2860 = vadd.xlane.f32.xlu0 %v2858_v8 }
0x1957   :  { %v2859_v49 = vmul.f32 %v2857_v9, %v2857_v9 }
0x1959   :  { %2862 = vadd.xlane.f32.xlu1 %v2859_v49 }
0x19de   :  { %v2861_v18 = vpop.xlane.xlu0 %2860 }
0x19df   :  { %v2864_v44 = vmul.f32 0.0078125, %v2861_v18 }
0x19e1   :  { %v2866_v19 = vadd.f32 1e-12, %v2864_v44 }
0x19e2   :  { %v2863_v21 = vpop.xlane.xlu1 %2862 }
0x19e3   :  { %4054 = vrsqrt.f32 %v2866_v19  ;;  %v2865_v22 = vmul.f32 0.0078125, %v2863_v21 }
0x19e5   :  { %v2867_v42 = vadd.f32 1e-12, %v2865_v22 }
0x19e7   :  { %4056 = vrsqrt.f32 %v2867_v42 }
0x19f0   :  { %v4055_v23 = vpop.eup %4054 }
0x19f1   :  { %v2870_v24 = vmul.f32 %v4055_v23, %v2856_v48 }
0x19f3   :  { %v2876_v30 = vmul.f32 %v3280_v26, %v2870_v24 }
0x19f4   :  { %v4057_v15 = vpop.eup %4056 }
0x19f5   :  { %v2871_v29 = vmul.f32 %v4057_v15, %v2857_v9  ;;  %v2882_v32 = vadd.f32 %v3281_v31, %v2876_v30 }
0x19f7   :  { %v2877_v20 = vmul.f32 %v3280_v26, %v2871_v29 }
0x19f9   :  { %v2883_v33 = vadd.f32 %v3281_v31, %v2877_v20 }
0x19fb   :  { %v2900_v34 = vpack.c.bf16 %v2883_v33, %v2882_v32 }
0x19fd   :  { %3739 = vmatmul.mubr.bf16.vlgmr.msra.gmra.mxu1 %v2900_v34 }
0x1abd   :  { %v2988_v28 = vpop.f32.mrf.mxu1 }
0x1abe   :  { %v2989_v39 = vadd.f32 %v3282_v27, %v2988_v28 }
0x1abf   :  { %v3740_v40 = vpop.f32.mrf.mxu1 }
0x1ac0   :  { %4058 = vtanh.f32 %v2989_v39 }
0x1ac1   :  { %v2991_v45 = vpop.f32.mrf.mxu1 }
0x1ac2   :  { %v2992_v46 = vadd.f32 %v3282_v27, %v2991_v45 }
0x1ac3   :  { %v3741_v47 = vpop.f32.mrf.mxu1 }
0x1ac4   :  { %4060 = vtanh.f32 %v2992_v46 }
0x1acd   :  { %v4059_v52 = vpop.eup %4058 }
0x1ad1   :  { %v4061_v5 = vpop.eup %4060 }
0x1ad2   :  { %v3013_v55 = vpack.c.bf16 %v4061_v5, %v4059_v52 }
0x1ad4   :  { %3759 = vmatmul.mubr.bf16.vlgmr.msra.gmra.mxu0 %v3013_v55 }
0x1b94   :  { %v3101_v56 = vpop.f32.mrf.mxu0 }
0x1b95   :  { %v3102_v57 = vadd.f32 %v3291_v2, %v3101_v56 }
0x1b96   :  { %v3760_v58 = vpop.f32.mrf.mxu0 }
0x1b97   :  { %3108 = vst [vmem:[%s4973_s5] sm:$0xff] %v3102_v57 }
0x1b98   :  { %v3104_v59 = vpop.f32.mrf.mxu0 }
0x1b99   :  { %v3105_v60 = vadd.f32 %v3291_v2, %v3104_v59 }
0x1b9a   :  { %v3761_v61 = vpop.f32.mrf.mxu0 }
0x1b9b   :  { %3109 = vst [vmem:[%s4973_s5 + $0x8] sm:$0xff] %v3105_v60 }

</bundles_post_ra>
